<compile_context>
chip_gen: v7x
topology: tpu7x:2x2x1
jax: 0.10.0
libtpu: 0.0.40
codegen_flags: <defaults>
</compile_context>

<pallas_src>
import jax
import jax.numpy as jnp
from jax.experimental import pallas as pl
from jax.experimental.pallas import tpu as pltpu

# ---- configuration (small, consistent with the module) ---------------------
B = 2            # batch
T = 8            # block_size / sequence length (dec and enc)
MODEL_DIM = 32   # model_dim
NUM_HEADS = 4
HEAD_DIM = MODEL_DIM // NUM_HEADS
MASK = True
LN_EPS = 1e-5
BT = B * T

# Lane-offset layout of the packed slabs (weight slab (D, 320); bias slab
# (1, 512) mirrors the first 320 lanes then appends the 6 LayerNorm vectors).
_W_QKV_S = (0, 96)      # self Wq|Wk|Wv
_W_O_S = (96, 128)      # self Wo
_W_Q_C = (128, 160)     # cross Wq
_W_KV_C = (160, 224)    # cross Wk|Wv
_W_O_C = (224, 256)     # cross Wo
_W_F1 = (256, 288)      # ffn W1
_W_F2 = (288, 320)      # ffn W2
_LN_OFF = 320           # bias slab: ln1_g, ln1_b, ln2_g, ln2_b, ln3_g, ln3_b


def decoder_block_kernel(dec_ref, enc_ref, w_ref, b_ref, out_ref):
    dec = dec_ref[...]                       # (BT, D)
    enc = enc_ref[...]                       # (BT, D)

    # causal predicate: built once, shared by both attention calls
    row = jax.lax.broadcasted_iota(jnp.int32, (T, T), 0)
    col = jax.lax.broadcasted_iota(jnp.int32, (T, T), 1)
    causal = (row >= col)[None]              # (1, T, T)

    scale = 1.0 / (float(MODEL_DIM) ** 0.5)  # torch divides by model_dim**0.5

    def W(span):
        lo, hi = span
        return w_ref[:, lo:hi]

    def Bv(span):
        lo, hi = span
        return b_ref[:, lo:hi]

    def layer_norm(x, i):
        g = b_ref[:, _LN_OFF + 64 * i: _LN_OFF + 64 * i + 32]        # (1, D)
        bb = b_ref[:, _LN_OFF + 64 * i + 32: _LN_OFF + 64 * i + 64]  # (1, D)
        mu = jnp.mean(x, axis=-1, keepdims=True)
        var = jnp.mean((x - mu) ** 2, axis=-1, keepdims=True)
        return (x - mu) * jax.lax.rsqrt(var + LN_EPS) * g + bb

    def attend(q, k, v):
        """q/k/v: (BT, D) with heads on lanes c = h*HEAD_DIM + hd."""
        q3 = q.reshape(B, T, MODEL_DIM)      # leading-dim regroup (free)
        k3 = k.reshape(B, T, MODEL_DIM)
        v3 = v.reshape(B, T, MODEL_DIM)
        outs = []
        for h in range(NUM_HEADS):           # static unroll; lane slices only
            sl = slice(h * HEAD_DIM, (h + 1) * HEAD_DIM)
            s = jnp.einsum('btd,bsd->bts', q3[:, :, sl], k3[:, :, sl],
                           preferred_element_type=jnp.float32) * scale
            if MASK:
                # finite sentinel: masked lanes stay on the normal FP path
                s = jnp.where(causal, s, -1e30)
            s = s - jnp.max(s, axis=-1, keepdims=True)
            p = jnp.exp(s)
            d = jnp.sum(p, axis=-1, keepdims=True)
            r = pl.reciprocal(d, approx=True)    # EUP slot (otherwise idle)
            r = r * (2.0 - d * r)                # one Newton step -> f32 parity
            outs.append(jnp.einsum('bts,bsd->btd', p * r, v3[:, :, sl],
                                   preferred_element_type=jnp.float32))
        o = jnp.concatenate(outs, axis=-1)       # heads back on lanes
        return o.reshape(BT, MODEL_DIM)

    # ---- self-attention + residual ------------------------------------------
    pre_x = layer_norm(dec, 0)
    qkv = (jnp.dot(pre_x, W(_W_QKV_S), preferred_element_type=jnp.float32)
           + Bv(_W_QKV_S))                                    # (BT, 3D)
    att = attend(qkv[:, 0:MODEL_DIM],
                 qkv[:, MODEL_DIM:2 * MODEL_DIM],
                 qkv[:, 2 * MODEL_DIM:3 * MODEL_DIM])
    x = (jnp.dot(att, W(_W_O_S), preferred_element_type=jnp.float32)
         + Bv(_W_O_S)) + dec

    # ---- cross-attention + residual ------------------------------------------
    xn = layer_norm(x, 1)
    qc = (jnp.dot(xn, W(_W_Q_C), preferred_element_type=jnp.float32)
          + Bv(_W_Q_C))                                       # (BT, D)
    kv = (jnp.dot(enc, W(_W_KV_C), preferred_element_type=jnp.float32)
          + Bv(_W_KV_C))                                      # (BT, 2D)
    att = attend(qc, kv[:, 0:MODEL_DIM], kv[:, MODEL_DIM:2 * MODEL_DIM])
    x = x + (jnp.dot(att, W(_W_O_C), preferred_element_type=jnp.float32)
             + Bv(_W_O_C))

    # ---- feed-forward + residual ----------------------------------------------
    xn = layer_norm(x, 2)
    hdn = jnp.maximum(
        jnp.dot(xn, W(_W_F1), preferred_element_type=jnp.float32) + Bv(_W_F1),
        0.0)
    ffn = (jnp.dot(hdn, W(_W_F2), preferred_element_type=jnp.float32)
           + Bv(_W_F2))
    out_ref[...] = ffn + x


# ---- one-time packing (hoisted out of the per-step hot path) ----------------
# canonical parameter stacks:
# w_stack (10, D, D): 0..3 self Wq,Wk,Wv,Wo | 4..7 cross Wq,Wk,Wv,Wo | 8 W1 | 9 W2
# b_stack (16, D):    0,1 ln1 g,b  2,3 ln2 g,b  4,5 ln3 g,b
#                     6..9 self bq,bk,bv,bo  10..13 cross bq,bk,bv,bo  14 b1  15 b2
def pack_params(w_stack, b_stack):
    w_slab = jnp.concatenate([w_stack[i] for i in range(10)], axis=1)  # (D, 320)
    b_order = [6, 7, 8, 9, 10, 11, 12, 13, 14, 15, 0, 1, 2, 3, 4, 5]
    b_slab = jnp.concatenate([b_stack[i] for i in b_order], axis=0)[None, :]
    return w_slab, b_slab                                              # (1, 512)


@jax.jit
def decoder_block(dec, enc, w_slab, b_slab):
    Bb, Tt, D = dec.shape
    dec2 = dec.reshape(Bb * Tt, D)
    enc2 = enc.reshape(-1, D)
    out2 = pl.pallas_call(
        decoder_block_kernel,
        out_shape=jax.ShapeDtypeStruct((Bb * Tt, D), jnp.float32),
        in_specs=[pl.BlockSpec(memory_space=pltpu.MemorySpace.VMEM)] * 4,
        out_specs=pl.BlockSpec(memory_space=pltpu.MemorySpace.VMEM),
    )(dec2, enc2, w_slab, b_slab)
    return out2.reshape(Bb, Tt, D)


# --------------------------- pure-JAX reference (torch semantics) ------------
def reference(dec, enc, w, b):
    def ln(x, g, bb):
        mu = x.mean(-1, keepdims=True)
        var = ((x - mu) ** 2).mean(-1, keepdims=True)
        return (x - mu) / jnp.sqrt(var + LN_EPS) * g + bb

    def mha(qi, ki, vi, wb, bb):
        q = qi @ w[wb] + b[bb]
        k = ki @ w[wb + 1] + b[bb + 1]
        v = vi @ w[wb + 2] + b[bb + 2]
        Bq, Tq, D = q.shape
        Tk = k.shape[1]
        qs = q.reshape(Bq, Tq, NUM_HEADS, HEAD_DIM).transpose(0, 2, 1, 3)
        ks = k.reshape(Bq, Tk, NUM_HEADS, HEAD_DIM).transpose(0, 2, 1, 3)
        vs = v.reshape(Bq, Tk, NUM_HEADS, HEAD_DIM).transpose(0, 2, 1, 3)
        s = (qs @ ks.transpose(0, 1, 3, 2)) / (float(MODEL_DIM) ** 0.5)
        if MASK:
            tril = jnp.tril(jnp.ones((Tq, Tk), dtype=bool))
            s = jnp.where(tril[None, None], s, -jnp.inf)
        p = jax.nn.softmax(s, axis=-1)
        o = (p @ vs).transpose(0, 2, 1, 3).reshape(Bq, Tq, MODEL_DIM)
        return o @ w[wb + 3] + b[bb + 3]

    pre_x = ln(dec, b[0], b[1])
    x = mha(pre_x, pre_x, pre_x, 0, 6) + dec
    xn = ln(x, b[2], b[3])
    x = x + mha(xn, enc, enc, 4, 10)
    xn = ln(x, b[4], b[5])
    h = jax.nn.relu(xn @ w[8] + b[14])
    return (h @ w[9] + b[15]) + x


if __name__ == "__main__":
    key = jax.random.PRNGKey(0)
    k_dec, k_enc, k_w, k_b, k_ln = jax.random.split(key, 5)

    dec = jax.random.normal(k_dec, (B, T, MODEL_DIM), dtype=jnp.float32)
    enc = jax.random.normal(k_enc, (B, T, MODEL_DIM), dtype=jnp.float32)

    # deterministic synthetic parameters
    w_stack = (jax.random.normal(k_w, (10, MODEL_DIM, MODEL_DIM),
                                 dtype=jnp.float32)
               * (1.0 / jnp.sqrt(MODEL_DIM)))
    b_stack = jax.random.normal(k_b, (16, MODEL_DIM), dtype=jnp.float32) * 0.05
    # layernorm gammas centered at 1.0 (rows 0, 2, 4)
    ln_g = 1.0 + 0.05 * jax.random.normal(k_ln, (3, MODEL_DIM),
                                          dtype=jnp.float32)
    b_stack = b_stack.at[jnp.array([0, 2, 4])].set(ln_g)

    # pack once (steady state: only decoder_block() runs per step)
    w_slab, b_slab = pack_params(w_stack, b_stack)
    w_slab, b_slab = jax.block_until_ready((w_slab, b_slab))

    out = decoder_block(dec, enc, w_slab, b_slab)
    out = jax.block_until_ready(out)

    ref = reference(dec, enc, w_stack, b_stack)
    assert out.shape == (B, T, MODEL_DIM)
    assert jnp.allclose(out, ref, atol=1e-4, rtol=1e-4), (
        float(jnp.max(jnp.abs(out - ref))))

    print("KERNEL_OK")
</pallas_src>

<mosaic_0001>
module attributes {stable_mosaic.version = 11 : i64} {
  func.func @decoder_block_kernel(%arg0: memref<16x32xf32, #tpu.memory_space<vmem>>, %arg1: memref<16x32xf32, #tpu.memory_space<vmem>>, %arg2: memref<32x320xf32, #tpu.memory_space<vmem>>, %arg3: memref<1x512xf32, #tpu.memory_space<vmem>>, %arg4: memref<16x32xf32, #tpu.memory_space<vmem>>) attributes {dimension_semantics = [], scalar_prefetch = 0 : i64, scratch_operands = 0 : i64, tpu.core_type = #tpu.core_type<tc>} {
    %c0 = arith.constant 0 : index
    %c0_0 = arith.constant 0 : index
    %0 = vector.load %arg0[%c0, %c0_0] : memref<16x32xf32, #tpu.memory_space<vmem>>, vector<16x32xf32>
    %c0_1 = arith.constant 0 : index
    %c0_2 = arith.constant 0 : index
    %1 = vector.load %arg1[%c0_1, %c0_2] : memref<16x32xf32, #tpu.memory_space<vmem>>, vector<16x32xf32>
    %2 = tpu.iota {dimensions = array<i32: 0>} : vector<8x8xi32>
    %3 = tpu.iota {dimensions = array<i32: 1>} : vector<8x8xi32>
    %4 = arith.cmpi sge, %2, %3 : vector<8x8xi32>
    %5 = vector.shape_cast %4 : vector<8x8xi1> to vector<1x8x8xi1>
    %c0_3 = arith.constant 0 : index
    %c320 = arith.constant 320 : index
    %6 = vector.load %arg3[%c0_3, %c320] : memref<1x512xf32, #tpu.memory_space<vmem>>, vector<1x32xf32>
    %c0_4 = arith.constant 0 : index
    %c352 = arith.constant 352 : index
    %7 = vector.load %arg3[%c0_4, %c352] : memref<1x512xf32, #tpu.memory_space<vmem>>, vector<1x32xf32>
    %cst = arith.constant dense<0.000000e+00> : vector<16xf32>
    %8 = vector.multi_reduction <add>, %0, %cst [1] : vector<16x32xf32> to vector<16xf32>
    %9 = vector.shape_cast %8 : vector<16xf32> to vector<16x1xf32>
    %cst_5 = arith.constant 3.200000e+01 : f32
    %10 = vector.broadcast %cst_5 : f32 to vector<16x1xf32>
    %11 = arith.divf %9, %10 : vector<16x1xf32>
    %12 = vector.broadcast %11 : vector<16x1xf32> to vector<16x32xf32>
    %13 = arith.subf %0, %12 : vector<16x32xf32>
    %14 = arith.mulf %13, %13 : vector<16x32xf32>
    %cst_6 = arith.constant dense<0.000000e+00> : vector<16xf32>
    %15 = vector.multi_reduction <add>, %14, %cst_6 [1] : vector<16x32xf32> to vector<16xf32>
    %16 = vector.shape_cast %15 : vector<16xf32> to vector<16x1xf32>
    %cst_7 = arith.constant 3.200000e+01 : f32
    %17 = vector.broadcast %cst_7 : f32 to vector<16x1xf32>
    %18 = arith.divf %16, %17 : vector<16x1xf32>
    %19 = vector.broadcast %11 : vector<16x1xf32> to vector<16x32xf32>
    %20 = arith.subf %0, %19 : vector<16x32xf32>
    %cst_8 = arith.constant 9.99999974E-6 : f32
    %21 = vector.broadcast %cst_8 : f32 to vector<16x1xf32>
    %22 = arith.addf %18, %21 : vector<16x1xf32>
    %23 = math.rsqrt %22 : vector<16x1xf32>
    %24 = vector.broadcast %23 : vector<16x1xf32> to vector<16x32xf32>
    %25 = arith.mulf %20, %24 : vector<16x32xf32>
    %26 = vector.broadcast %6 : vector<1x32xf32> to vector<16x32xf32>
    %27 = arith.mulf %25, %26 : vector<16x32xf32>
    %28 = vector.broadcast %7 : vector<1x32xf32> to vector<16x32xf32>
    %29 = arith.addf %27, %28 : vector<16x32xf32>
    %c0_9 = arith.constant 0 : index
    %c0_10 = arith.constant 0 : index
    %30 = vector.load %arg2[%c0_9, %c0_10] : memref<32x320xf32, #tpu.memory_space<vmem>>, vector<32x96xf32>
    %cst_11 = arith.constant dense<0.000000e+00> : vector<16x96xf32>
    %31 = tpu.matmul %29, %30, %cst_11 {dimension_numbers = #tpu.dot_dimension_numbers<[1], [0], [0], [1], [0, 0, 1, 1], [], []>} : vector<16x32xf32>, vector<32x96xf32>, vector<16x96xf32> -> vector<16x96xf32>
    %c0_12 = arith.constant 0 : index
    %c0_13 = arith.constant 0 : index
    %32 = vector.load %arg3[%c0_12, %c0_13] : memref<1x512xf32, #tpu.memory_space<vmem>>, vector<1x96xf32>
    %33 = vector.broadcast %32 : vector<1x96xf32> to vector<16x96xf32>
    %34 = arith.addf %31, %33 : vector<16x96xf32>
    %35 = vector.extract_strided_slice %34 {offsets = [0, 0], sizes = [16, 32], strides = [1, 1]} : vector<16x96xf32> to vector<16x32xf32>
    %36 = vector.extract_strided_slice %34 {offsets = [0, 32], sizes = [16, 32], strides = [1, 1]} : vector<16x96xf32> to vector<16x32xf32>
    %37 = vector.extract_strided_slice %34 {offsets = [0, 64], sizes = [16, 32], strides = [1, 1]} : vector<16x96xf32> to vector<16x32xf32>
    %38 = vector.shape_cast %35 : vector<16x32xf32> to vector<2x8x32xf32>
    %39 = vector.shape_cast %36 : vector<16x32xf32> to vector<2x8x32xf32>
    %40 = vector.shape_cast %37 : vector<16x32xf32> to vector<2x8x32xf32>
    %41 = vector.extract_strided_slice %38 {offsets = [0, 0, 0], sizes = [2, 8, 8], strides = [1, 1, 1]} : vector<2x8x32xf32> to vector<2x8x8xf32>
    %42 = vector.extract_strided_slice %39 {offsets = [0, 0, 0], sizes = [2, 8, 8], strides = [1, 1, 1]} : vector<2x8x32xf32> to vector<2x8x8xf32>
    "tpu.trace_start"() <{level = 10 : i32, message = "btd,bsd->bts"}> : () -> ()
    %cst_14 = arith.constant dense<0.000000e+00> : vector<2x8x8xf32>
    %43 = tpu.matmul %41, %42, %cst_14 {dimension_numbers = #tpu.dot_dimension_numbers<[2], [2], [1], [1], [0, 0, 0, 1, 1, 1], [0], [0]>} : vector<2x8x8xf32>, vector<2x8x8xf32>, vector<2x8x8xf32> -> vector<2x8x8xf32>
    "tpu.trace_stop"() : () -> ()
    %cst_15 = arith.constant 0.176776692 : f32
    %44 = vector.broadcast %cst_15 : f32 to vector<2x8x8xf32>
    %45 = arith.mulf %43, %44 : vector<2x8x8xf32>
    %cst_16 = arith.constant -1.000000e+30 : f32
    %46 = vector.shape_cast %5 : vector<1x8x8xi1> to vector<1x8x8xi1>
    %47 = vector.broadcast %46 : vector<1x8x8xi1> to vector<2x8x8xi1>
    %48 = vector.broadcast %cst_16 : f32 to vector<2x8x8xf32>
    %49 = arith.select %47, %45, %48 : vector<2x8x8xi1>, vector<2x8x8xf32>
    %cst_17 = arith.constant dense<0xFF800000> : vector<2x8xf32>
    %50 = vector.multi_reduction <maximumf>, %49, %cst_17 [2] : vector<2x8x8xf32> to vector<2x8xf32>
    %51 = vector.shape_cast %50 : vector<2x8xf32> to vector<2x8x1xf32>
    %52 = vector.broadcast %51 : vector<2x8x1xf32> to vector<2x8x8xf32>
    %53 = arith.subf %49, %52 : vector<2x8x8xf32>
    %54 = math.exp %53 : vector<2x8x8xf32>
    %cst_18 = arith.constant dense<0.000000e+00> : vector<2x8xf32>
    %55 = vector.multi_reduction <add>, %54, %cst_18 [2] : vector<2x8x8xf32> to vector<2x8xf32>
    %56 = vector.shape_cast %55 : vector<2x8xf32> to vector<2x8x1xf32>
    %57 = tpu.reciprocal %56 {approx = true} : vector<2x8x1xf32> -> vector<2x8x1xf32>
    %58 = arith.mulf %56, %57 : vector<2x8x1xf32>
    %cst_19 = arith.constant 2.000000e+00 : f32
    %59 = vector.broadcast %cst_19 : f32 to vector<2x8x1xf32>
    %60 = arith.subf %59, %58 : vector<2x8x1xf32>
    %61 = arith.mulf %57, %60 : vector<2x8x1xf32>
    %62 = vector.broadcast %61 : vector<2x8x1xf32> to vector<2x8x8xf32>
    %63 = arith.mulf %54, %62 : vector<2x8x8xf32>
    %64 = vector.extract_strided_slice %40 {offsets = [0, 0, 0], sizes = [2, 8, 8], strides = [1, 1, 1]} : vector<2x8x32xf32> to vector<2x8x8xf32>
    "tpu.trace_start"() <{level = 10 : i32, message = "bts,bsd->btd"}> : () -> ()
    %cst_20 = arith.constant dense<0.000000e+00> : vector<2x8x8xf32>
    %65 = tpu.matmul %63, %64, %cst_20 {dimension_numbers = #tpu.dot_dimension_numbers<[2], [1], [1], [2], [0, 0, 0, 1, 1, 2], [0], [0]>} : vector<2x8x8xf32>, vector<2x8x8xf32>, vector<2x8x8xf32> -> vector<2x8x8xf32>
    "tpu.trace_stop"() : () -> ()
    %66 = vector.extract_strided_slice %38 {offsets = [0, 0, 8], sizes = [2, 8, 8], strides = [1, 1, 1]} : vector<2x8x32xf32> to vector<2x8x8xf32>
    %67 = vector.extract_strided_slice %39 {offsets = [0, 0, 8], sizes = [2, 8, 8], strides = [1, 1, 1]} : vector<2x8x32xf32> to vector<2x8x8xf32>
    "tpu.trace_start"() <{level = 10 : i32, message = "btd,bsd->bts"}> : () -> ()
    %cst_21 = arith.constant dense<0.000000e+00> : vector<2x8x8xf32>
    %68 = tpu.matmul %66, %67, %cst_21 {dimension_numbers = #tpu.dot_dimension_numbers<[2], [2], [1], [1], [0, 0, 0, 1, 1, 1], [0], [0]>} : vector<2x8x8xf32>, vector<2x8x8xf32>, vector<2x8x8xf32> -> vector<2x8x8xf32>
    "tpu.trace_stop"() : () -> ()
    %cst_22 = arith.constant 0.176776692 : f32
    %69 = vector.broadcast %cst_22 : f32 to vector<2x8x8xf32>
    %70 = arith.mulf %68, %69 : vector<2x8x8xf32>
    %cst_23 = arith.constant -1.000000e+30 : f32
    %71 = vector.shape_cast %5 : vector<1x8x8xi1> to vector<1x8x8xi1>
    %72 = vector.broadcast %71 : vector<1x8x8xi1> to vector<2x8x8xi1>
    %73 = vector.broadcast %cst_23 : f32 to vector<2x8x8xf32>
    %74 = arith.select %72, %70, %73 : vector<2x8x8xi1>, vector<2x8x8xf32>
    %cst_24 = arith.constant dense<0xFF800000> : vector<2x8xf32>
    %75 = vector.multi_reduction <maximumf>, %74, %cst_24 [2] : vector<2x8x8xf32> to vector<2x8xf32>
    %76 = vector.shape_cast %75 : vector<2x8xf32> to vector<2x8x1xf32>
    %77 = vector.broadcast %76 : vector<2x8x1xf32> to vector<2x8x8xf32>
    %78 = arith.subf %74, %77 : vector<2x8x8xf32>
    %79 = math.exp %78 : vector<2x8x8xf32>
    %cst_25 = arith.constant dense<0.000000e+00> : vector<2x8xf32>
    %80 = vector.multi_reduction <add>, %79, %cst_25 [2] : vector<2x8x8xf32> to vector<2x8xf32>
    %81 = vector.shape_cast %80 : vector<2x8xf32> to vector<2x8x1xf32>
    %82 = tpu.reciprocal %81 {approx = true} : vector<2x8x1xf32> -> vector<2x8x1xf32>
    %83 = arith.mulf %81, %82 : vector<2x8x1xf32>
    %cst_26 = arith.constant 2.000000e+00 : f32
    %84 = vector.broadcast %cst_26 : f32 to vector<2x8x1xf32>
    %85 = arith.subf %84, %83 : vector<2x8x1xf32>
    %86 = arith.mulf %82, %85 : vector<2x8x1xf32>
    %87 = vector.broadcast %86 : vector<2x8x1xf32> to vector<2x8x8xf32>
    %88 = arith.mulf %79, %87 : vector<2x8x8xf32>
    %89 = vector.extract_strided_slice %40 {offsets = [0, 0, 8], sizes = [2, 8, 8], strides = [1, 1, 1]} : vector<2x8x32xf32> to vector<2x8x8xf32>
    "tpu.trace_start"() <{level = 10 : i32, message = "bts,bsd->btd"}> : () -> ()
    %cst_27 = arith.constant dense<0.000000e+00> : vector<2x8x8xf32>
    %90 = tpu.matmul %88, %89, %cst_27 {dimension_numbers = #tpu.dot_dimension_numbers<[2], [1], [1], [2], [0, 0, 0, 1, 1, 2], [0], [0]>} : vector<2x8x8xf32>, vector<2x8x8xf32>, vector<2x8x8xf32> -> vector<2x8x8xf32>
    "tpu.trace_stop"() : () -> ()
    %91 = vector.extract_strided_slice %38 {offsets = [0, 0, 16], sizes = [2, 8, 8], strides = [1, 1, 1]} : vector<2x8x32xf32> to vector<2x8x8xf32>
    %92 = vector.extract_strided_slice %39 {offsets = [0, 0, 16], sizes = [2, 8, 8], strides = [1, 1, 1]} : vector<2x8x32xf32> to vector<2x8x8xf32>
    "tpu.trace_start"() <{level = 10 : i32, message = "btd,bsd->bts"}> : () -> ()
    %cst_28 = arith.constant dense<0.000000e+00> : vector<2x8x8xf32>
    %93 = tpu.matmul %91, %92, %cst_28 {dimension_numbers = #tpu.dot_dimension_numbers<[2], [2], [1], [1], [0, 0, 0, 1, 1, 1], [0], [0]>} : vector<2x8x8xf32>, vector<2x8x8xf32>, vector<2x8x8xf32> -> vector<2x8x8xf32>
    "tpu.trace_stop"() : () -> ()
    %cst_29 = arith.constant 0.176776692 : f32
    %94 = vector.broadcast %cst_29 : f32 to vector<2x8x8xf32>
    %95 = arith.mulf %93, %94 : vector<2x8x8xf32>
    %cst_30 = arith.constant -1.000000e+30 : f32
    %96 = vector.shape_cast %5 : vector<1x8x8xi1> to vector<1x8x8xi1>
    %97 = vector.broadcast %96 : vector<1x8x8xi1> to vector<2x8x8xi1>
    %98 = vector.broadcast %cst_30 : f32 to vector<2x8x8xf32>
    %99 = arith.select %97, %95, %98 : vector<2x8x8xi1>, vector<2x8x8xf32>
    %cst_31 = arith.constant dense<0xFF800000> : vector<2x8xf32>
    %100 = vector.multi_reduction <maximumf>, %99, %cst_31 [2] : vector<2x8x8xf32> to vector<2x8xf32>
    %101 = vector.shape_cast %100 : vector<2x8xf32> to vector<2x8x1xf32>
    %102 = vector.broadcast %101 : vector<2x8x1xf32> to vector<2x8x8xf32>
    %103 = arith.subf %99, %102 : vector<2x8x8xf32>
    %104 = math.exp %103 : vector<2x8x8xf32>
    %cst_32 = arith.constant dense<0.000000e+00> : vector<2x8xf32>
    %105 = vector.multi_reduction <add>, %104, %cst_32 [2] : vector<2x8x8xf32> to vector<2x8xf32>
    %106 = vector.shape_cast %105 : vector<2x8xf32> to vector<2x8x1xf32>
    %107 = tpu.reciprocal %106 {approx = true} : vector<2x8x1xf32> -> vector<2x8x1xf32>
    %108 = arith.mulf %106, %107 : vector<2x8x1xf32>
    %cst_33 = arith.constant 2.000000e+00 : f32
    %109 = vector.broadcast %cst_33 : f32 to vector<2x8x1xf32>
    %110 = arith.subf %109, %108 : vector<2x8x1xf32>
    %111 = arith.mulf %107, %110 : vector<2x8x1xf32>
    %112 = vector.broadcast %111 : vector<2x8x1xf32> to vector<2x8x8xf32>
    %113 = arith.mulf %104, %112 : vector<2x8x8xf32>
    %114 = vector.extract_strided_slice %40 {offsets = [0, 0, 16], sizes = [2, 8, 8], strides = [1, 1, 1]} : vector<2x8x32xf32> to vector<2x8x8xf32>
    "tpu.trace_start"() <{level = 10 : i32, message = "bts,bsd->btd"}> : () -> ()
    %cst_34 = arith.constant dense<0.000000e+00> : vector<2x8x8xf32>
    %115 = tpu.matmul %113, %114, %cst_34 {dimension_numbers = #tpu.dot_dimension_numbers<[2], [1], [1], [2], [0, 0, 0, 1, 1, 2], [0], [0]>} : vector<2x8x8xf32>, vector<2x8x8xf32>, vector<2x8x8xf32> -> vector<2x8x8xf32>
    "tpu.trace_stop"() : () -> ()
    %116 = vector.extract_strided_slice %38 {offsets = [0, 0, 24], sizes = [2, 8, 8], strides = [1, 1, 1]} : vector<2x8x32xf32> to vector<2x8x8xf32>
    %117 = vector.extract_strided_slice %39 {offsets = [0, 0, 24], sizes = [2, 8, 8], strides = [1, 1, 1]} : vector<2x8x32xf32> to vector<2x8x8xf32>
    "tpu.trace_start"() <{level = 10 : i32, message = "btd,bsd->bts"}> : () -> ()
    %cst_35 = arith.constant dense<0.000000e+00> : vector<2x8x8xf32>
    %118 = tpu.matmul %116, %117, %cst_35 {dimension_numbers = #tpu.dot_dimension_numbers<[2], [2], [1], [1], [0, 0, 0, 1, 1, 1], [0], [0]>} : vector<2x8x8xf32>, vector<2x8x8xf32>, vector<2x8x8xf32> -> vector<2x8x8xf32>
    "tpu.trace_stop"() : () -> ()
    %cst_36 = arith.constant 0.176776692 : f32
    %119 = vector.broadcast %cst_36 : f32 to vector<2x8x8xf32>
    %120 = arith.mulf %118, %119 : vector<2x8x8xf32>
    %cst_37 = arith.constant -1.000000e+30 : f32
    %121 = vector.shape_cast %5 : vector<1x8x8xi1> to vector<1x8x8xi1>
    %122 = vector.broadcast %121 : vector<1x8x8xi1> to vector<2x8x8xi1>
    %123 = vector.broadcast %cst_37 : f32 to vector<2x8x8xf32>
    %124 = arith.select %122, %120, %123 : vector<2x8x8xi1>, vector<2x8x8xf32>
    %cst_38 = arith.constant dense<0xFF800000> : vector<2x8xf32>
    %125 = vector.multi_reduction <maximumf>, %124, %cst_38 [2] : vector<2x8x8xf32> to vector<2x8xf32>
    %126 = vector.shape_cast %125 : vector<2x8xf32> to vector<2x8x1xf32>
    %127 = vector.broadcast %126 : vector<2x8x1xf32> to vector<2x8x8xf32>
    %128 = arith.subf %124, %127 : vector<2x8x8xf32>
    %129 = math.exp %128 : vector<2x8x8xf32>
    %cst_39 = arith.constant dense<0.000000e+00> : vector<2x8xf32>
    %130 = vector.multi_reduction <add>, %129, %cst_39 [2] : vector<2x8x8xf32> to vector<2x8xf32>
    %131 = vector.shape_cast %130 : vector<2x8xf32> to vector<2x8x1xf32>
    %132 = tpu.reciprocal %131 {approx = true} : vector<2x8x1xf32> -> vector<2x8x1xf32>
    %133 = arith.mulf %131, %132 : vector<2x8x1xf32>
    %cst_40 = arith.constant 2.000000e+00 : f32
    %134 = vector.broadcast %cst_40 : f32 to vector<2x8x1xf32>
    %135 = arith.subf %134, %133 : vector<2x8x1xf32>
    %136 = arith.mulf %132, %135 : vector<2x8x1xf32>
    %137 = vector.broadcast %136 : vector<2x8x1xf32> to vector<2x8x8xf32>
    %138 = arith.mulf %129, %137 : vector<2x8x8xf32>
    %139 = vector.extract_strided_slice %40 {offsets = [0, 0, 24], sizes = [2, 8, 8], strides = [1, 1, 1]} : vector<2x8x32xf32> to vector<2x8x8xf32>
    "tpu.trace_start"() <{level = 10 : i32, message = "bts,bsd->btd"}> : () -> ()
    %cst_41 = arith.constant dense<0.000000e+00> : vector<2x8x8xf32>
    %140 = tpu.matmul %138, %139, %cst_41 {dimension_numbers = #tpu.dot_dimension_numbers<[2], [1], [1], [2], [0, 0, 0, 1, 1, 2], [0], [0]>} : vector<2x8x8xf32>, vector<2x8x8xf32>, vector<2x8x8xf32> -> vector<2x8x8xf32>
    "tpu.trace_stop"() : () -> ()
    %141 = tpu.concatenate %65, %90, %115, %140 in 2 : vector<2x8x8xf32>, vector<2x8x8xf32>, vector<2x8x8xf32>, vector<2x8x8xf32> -> vector<2x8x32xf32>
    %142 = vector.shape_cast %141 : vector<2x8x32xf32> to vector<16x32xf32>
    %c0_42 = arith.constant 0 : index
    %c96 = arith.constant 96 : index
    %143 = vector.load %arg2[%c0_42, %c96] : memref<32x320xf32, #tpu.memory_space<vmem>>, vector<32x32xf32>
    %cst_43 = arith.constant dense<0.000000e+00> : vector<16x32xf32>
    %144 = tpu.matmul %142, %143, %cst_43 {dimension_numbers = #tpu.dot_dimension_numbers<[1], [0], [0], [1], [0, 0, 1, 1], [], []>} : vector<16x32xf32>, vector<32x32xf32>, vector<16x32xf32> -> vector<16x32xf32>
    %c0_44 = arith.constant 0 : index
    %c96_45 = arith.constant 96 : index
    %145 = vector.load %arg3[%c0_44, %c96_45] : memref<1x512xf32, #tpu.memory_space<vmem>>, vector<1x32xf32>
    %146 = vector.broadcast %145 : vector<1x32xf32> to vector<16x32xf32>
    %147 = arith.addf %144, %146 : vector<16x32xf32>
    %148 = arith.addf %147, %0 : vector<16x32xf32>
    %c0_46 = arith.constant 0 : index
    %c384 = arith.constant 384 : index
    %149 = vector.load %arg3[%c0_46, %c384] : memref<1x512xf32, #tpu.memory_space<vmem>>, vector<1x32xf32>
    %c0_47 = arith.constant 0 : index
    %c416 = arith.constant 416 : index
    %150 = vector.load %arg3[%c0_47, %c416] : memref<1x512xf32, #tpu.memory_space<vmem>>, vector<1x32xf32>
    %cst_48 = arith.constant dense<0.000000e+00> : vector<16xf32>
    %151 = vector.multi_reduction <add>, %148, %cst_48 [1] : vector<16x32xf32> to vector<16xf32>
    %152 = vector.shape_cast %151 : vector<16xf32> to vector<16x1xf32>
    %cst_49 = arith.constant 3.200000e+01 : f32
    %153 = vector.broadcast %cst_49 : f32 to vector<16x1xf32>
    %154 = arith.divf %152, %153 : vector<16x1xf32>
    %155 = vector.broadcast %154 : vector<16x1xf32> to vector<16x32xf32>
    %156 = arith.subf %148, %155 : vector<16x32xf32>
    %157 = arith.mulf %156, %156 : vector<16x32xf32>
    %cst_50 = arith.constant dense<0.000000e+00> : vector<16xf32>
    %158 = vector.multi_reduction <add>, %157, %cst_50 [1] : vector<16x32xf32> to vector<16xf32>
    %159 = vector.shape_cast %158 : vector<16xf32> to vector<16x1xf32>
    %cst_51 = arith.constant 3.200000e+01 : f32
    %160 = vector.broadcast %cst_51 : f32 to vector<16x1xf32>
    %161 = arith.divf %159, %160 : vector<16x1xf32>
    %162 = vector.broadcast %154 : vector<16x1xf32> to vector<16x32xf32>
    %163 = arith.subf %148, %162 : vector<16x32xf32>
    %cst_52 = arith.constant 9.99999974E-6 : f32
    %164 = vector.broadcast %cst_52 : f32 to vector<16x1xf32>
    %165 = arith.addf %161, %164 : vector<16x1xf32>
    %166 = math.rsqrt %165 : vector<16x1xf32>
    %167 = vector.broadcast %166 : vector<16x1xf32> to vector<16x32xf32>
    %168 = arith.mulf %163, %167 : vector<16x32xf32>
    %169 = vector.broadcast %149 : vector<1x32xf32> to vector<16x32xf32>
    %170 = arith.mulf %168, %169 : vector<16x32xf32>
    %171 = vector.broadcast %150 : vector<1x32xf32> to vector<16x32xf32>
    %172 = arith.addf %170, %171 : vector<16x32xf32>
    %c0_53 = arith.constant 0 : index
    %c128 = arith.constant 128 : index
    %173 = vector.load %arg2[%c0_53, %c128] : memref<32x320xf32, #tpu.memory_space<vmem>>, vector<32x32xf32>
    %cst_54 = arith.constant dense<0.000000e+00> : vector<16x32xf32>
    %174 = tpu.matmul %172, %173, %cst_54 {dimension_numbers = #tpu.dot_dimension_numbers<[1], [0], [0], [1], [0, 0, 1, 1], [], []>} : vector<16x32xf32>, vector<32x32xf32>, vector<16x32xf32> -> vector<16x32xf32>
    %c0_55 = arith.constant 0 : index
    %c128_56 = arith.constant 128 : index
    %175 = vector.load %arg3[%c0_55, %c128_56] : memref<1x512xf32, #tpu.memory_space<vmem>>, vector<1x32xf32>
    %176 = vector.broadcast %175 : vector<1x32xf32> to vector<16x32xf32>
    %177 = arith.addf %174, %176 : vector<16x32xf32>
    %c0_57 = arith.constant 0 : index
    %c160 = arith.constant 160 : index
    %178 = vector.load %arg2[%c0_57, %c160] : memref<32x320xf32, #tpu.memory_space<vmem>>, vector<32x64xf32>
    %cst_58 = arith.constant dense<0.000000e+00> : vector<16x64xf32>
    %179 = tpu.matmul %1, %178, %cst_58 {dimension_numbers = #tpu.dot_dimension_numbers<[1], [0], [0], [1], [0, 0, 1, 1], [], []>} : vector<16x32xf32>, vector<32x64xf32>, vector<16x64xf32> -> vector<16x64xf32>
    %c0_59 = arith.constant 0 : index
    %c160_60 = arith.constant 160 : index
    %180 = vector.load %arg3[%c0_59, %c160_60] : memref<1x512xf32, #tpu.memory_space<vmem>>, vector<1x64xf32>
    %181 = vector.broadcast %180 : vector<1x64xf32> to vector<16x64xf32>
    %182 = arith.addf %179, %181 : vector<16x64xf32>
    %183 = vector.extract_strided_slice %182 {offsets = [0, 0], sizes = [16, 32], strides = [1, 1]} : vector<16x64xf32> to vector<16x32xf32>
    %184 = vector.extract_strided_slice %182 {offsets = [0, 32], sizes = [16, 32], strides = [1, 1]} : vector<16x64xf32> to vector<16x32xf32>
    %185 = vector.shape_cast %177 : vector<16x32xf32> to vector<2x8x32xf32>
    %186 = vector.shape_cast %183 : vector<16x32xf32> to vector<2x8x32xf32>
    %187 = vector.shape_cast %184 : vector<16x32xf32> to vector<2x8x32xf32>
    %188 = vector.extract_strided_slice %185 {offsets = [0, 0, 0], sizes = [2, 8, 8], strides = [1, 1, 1]} : vector<2x8x32xf32> to vector<2x8x8xf32>
    %189 = vector.extract_strided_slice %186 {offsets = [0, 0, 0], sizes = [2, 8, 8], strides = [1, 1, 1]} : vector<2x8x32xf32> to vector<2x8x8xf32>
    "tpu.trace_start"() <{level = 10 : i32, message = "btd,bsd->bts"}> : () -> ()
    %cst_61 = arith.constant dense<0.000000e+00> : vector<2x8x8xf32>
    %190 = tpu.matmul %188, %189, %cst_61 {dimension_numbers = #tpu.dot_dimension_numbers<[2], [2], [1], [1], [0, 0, 0, 1, 1, 1], [0], [0]>} : vector<2x8x8xf32>, vector<2x8x8xf32>, vector<2x8x8xf32> -> vector<2x8x8xf32>
    "tpu.trace_stop"() : () -> ()
    %cst_62 = arith.constant 0.176776692 : f32
    %191 = vector.broadcast %cst_62 : f32 to vector<2x8x8xf32>
    %192 = arith.mulf %190, %191 : vector<2x8x8xf32>
    %cst_63 = arith.constant -1.000000e+30 : f32
    %193 = vector.shape_cast %5 : vector<1x8x8xi1> to vector<1x8x8xi1>
    %194 = vector.broadcast %193 : vector<1x8x8xi1> to vector<2x8x8xi1>
    %195 = vector.broadcast %cst_63 : f32 to vector<2x8x8xf32>
    %196 = arith.select %194, %192, %195 : vector<2x8x8xi1>, vector<2x8x8xf32>
    %cst_64 = arith.constant dense<0xFF800000> : vector<2x8xf32>
    %197 = vector.multi_reduction <maximumf>, %196, %cst_64 [2] : vector<2x8x8xf32> to vector<2x8xf32>
    %198 = vector.shape_cast %197 : vector<2x8xf32> to vector<2x8x1xf32>
    %199 = vector.broadcast %198 : vector<2x8x1xf32> to vector<2x8x8xf32>
    %200 = arith.subf %196, %199 : vector<2x8x8xf32>
    %201 = math.exp %200 : vector<2x8x8xf32>
    %cst_65 = arith.constant dense<0.000000e+00> : vector<2x8xf32>
    %202 = vector.multi_reduction <add>, %201, %cst_65 [2] : vector<2x8x8xf32> to vector<2x8xf32>
    %203 = vector.shape_cast %202 : vector<2x8xf32> to vector<2x8x1xf32>
    %204 = tpu.reciprocal %203 {approx = true} : vector<2x8x1xf32> -> vector<2x8x1xf32>
    %205 = arith.mulf %203, %204 : vector<2x8x1xf32>
    %cst_66 = arith.constant 2.000000e+00 : f32
    %206 = vector.broadcast %cst_66 : f32 to vector<2x8x1xf32>
    %207 = arith.subf %206, %205 : vector<2x8x1xf32>
    %208 = arith.mulf %204, %207 : vector<2x8x1xf32>
    %209 = vector.broadcast %208 : vector<2x8x1xf32> to vector<2x8x8xf32>
    %210 = arith.mulf %201, %209 : vector<2x8x8xf32>
    %211 = vector.extract_strided_slice %187 {offsets = [0, 0, 0], sizes = [2, 8, 8], strides = [1, 1, 1]} : vector<2x8x32xf32> to vector<2x8x8xf32>
    "tpu.trace_start"() <{level = 10 : i32, message = "bts,bsd->btd"}> : () -> ()
    %cst_67 = arith.constant dense<0.000000e+00> : vector<2x8x8xf32>
    %212 = tpu.matmul %210, %211, %cst_67 {dimension_numbers = #tpu.dot_dimension_numbers<[2], [1], [1], [2], [0, 0, 0, 1, 1, 2], [0], [0]>} : vector<2x8x8xf32>, vector<2x8x8xf32>, vector<2x8x8xf32> -> vector<2x8x8xf32>
    "tpu.trace_stop"() : () -> ()
    %213 = vector.extract_strided_slice %185 {offsets = [0, 0, 8], sizes = [2, 8, 8], strides = [1, 1, 1]} : vector<2x8x32xf32> to vector<2x8x8xf32>
    %214 = vector.extract_strided_slice %186 {offsets = [0, 0, 8], sizes = [2, 8, 8], strides = [1, 1, 1]} : vector<2x8x32xf32> to vector<2x8x8xf32>
    "tpu.trace_start"() <{level = 10 : i32, message = "btd,bsd->bts"}> : () -> ()
    %cst_68 = arith.constant dense<0.000000e+00> : vector<2x8x8xf32>
    %215 = tpu.matmul %213, %214, %cst_68 {dimension_numbers = #tpu.dot_dimension_numbers<[2], [2], [1], [1], [0, 0, 0, 1, 1, 1], [0], [0]>} : vector<2x8x8xf32>, vector<2x8x8xf32>, vector<2x8x8xf32> -> vector<2x8x8xf32>
    "tpu.trace_stop"() : () -> ()
    %cst_69 = arith.constant 0.176776692 : f32
    %216 = vector.broadcast %cst_69 : f32 to vector<2x8x8xf32>
    %217 = arith.mulf %215, %216 : vector<2x8x8xf32>
    %cst_70 = arith.constant -1.000000e+30 : f32
    %218 = vector.shape_cast %5 : vector<1x8x8xi1> to vector<1x8x8xi1>
    %219 = vector.broadcast %218 : vector<1x8x8xi1> to vector<2x8x8xi1>
    %220 = vector.broadcast %cst_70 : f32 to vector<2x8x8xf32>
    %221 = arith.select %219, %217, %220 : vector<2x8x8xi1>, vector<2x8x8xf32>
    %cst_71 = arith.constant dense<0xFF800000> : vector<2x8xf32>
    %222 = vector.multi_reduction <maximumf>, %221, %cst_71 [2] : vector<2x8x8xf32> to vector<2x8xf32>
    %223 = vector.shape_cast %222 : vector<2x8xf32> to vector<2x8x1xf32>
    %224 = vector.broadcast %223 : vector<2x8x1xf32> to vector<2x8x8xf32>
    %225 = arith.subf %221, %224 : vector<2x8x8xf32>
    %226 = math.exp %225 : vector<2x8x8xf32>
    %cst_72 = arith.constant dense<0.000000e+00> : vector<2x8xf32>
    %227 = vector.multi_reduction <add>, %226, %cst_72 [2] : vector<2x8x8xf32> to vector<2x8xf32>
    %228 = vector.shape_cast %227 : vector<2x8xf32> to vector<2x8x1xf32>
    %229 = tpu.reciprocal %228 {approx = true} : vector<2x8x1xf32> -> vector<2x8x1xf32>
    %230 = arith.mulf %228, %229 : vector<2x8x1xf32>
    %cst_73 = arith.constant 2.000000e+00 : f32
    %231 = vector.broadcast %cst_73 : f32 to vector<2x8x1xf32>
    %232 = arith.subf %231, %230 : vector<2x8x1xf32>
    %233 = arith.mulf %229, %232 : vector<2x8x1xf32>
    %234 = vector.broadcast %233 : vector<2x8x1xf32> to vector<2x8x8xf32>
    %235 = arith.mulf %226, %234 : vector<2x8x8xf32>
    %236 = vector.extract_strided_slice %187 {offsets = [0, 0, 8], sizes = [2, 8, 8], strides = [1, 1, 1]} : vector<2x8x32xf32> to vector<2x8x8xf32>
    "tpu.trace_start"() <{level = 10 : i32, message = "bts,bsd->btd"}> : () -> ()
    %cst_74 = arith.constant dense<0.000000e+00> : vector<2x8x8xf32>
    %237 = tpu.matmul %235, %236, %cst_74 {dimension_numbers = #tpu.dot_dimension_numbers<[2], [1], [1], [2], [0, 0, 0, 1, 1, 2], [0], [0]>} : vector<2x8x8xf32>, vector<2x8x8xf32>, vector<2x8x8xf32> -> vector<2x8x8xf32>
    "tpu.trace_stop"() : () -> ()
    %238 = vector.extract_strided_slice %185 {offsets = [0, 0, 16], sizes = [2, 8, 8], strides = [1, 1, 1]} : vector<2x8x32xf32> to vector<2x8x8xf32>
    %239 = vector.extract_strided_slice %186 {offsets = [0, 0, 16], sizes = [2, 8, 8], strides = [1, 1, 1]} : vector<2x8x32xf32> to vector<2x8x8xf32>
    "tpu.trace_start"() <{level = 10 : i32, message = "btd,bsd->bts"}> : () -> ()
    %cst_75 = arith.constant dense<0.000000e+00> : vector<2x8x8xf32>
    %240 = tpu.matmul %238, %239, %cst_75 {dimension_numbers = #tpu.dot_dimension_numbers<[2], [2], [1], [1], [0, 0, 0, 1, 1, 1], [0], [0]>} : vector<2x8x8xf32>, vector<2x8x8xf32>, vector<2x8x8xf32> -> vector<2x8x8xf32>
    "tpu.trace_stop"() : () -> ()
    %cst_76 = arith.constant 0.176776692 : f32
    %241 = vector.broadcast %cst_76 : f32 to vector<2x8x8xf32>
    %242 = arith.mulf %240, %241 : vector<2x8x8xf32>
    %cst_77 = arith.constant -1.000000e+30 : f32
    %243 = vector.shape_cast %5 : vector<1x8x8xi1> to vector<1x8x8xi1>
    %244 = vector.broadcast %243 : vector<1x8x8xi1> to vector<2x8x8xi1>
    %245 = vector.broadcast %cst_77 : f32 to vector<2x8x8xf32>
    %246 = arith.select %244, %242, %245 : vector<2x8x8xi1>, vector<2x8x8xf32>
    %cst_78 = arith.constant dense<0xFF800000> : vector<2x8xf32>
    %247 = vector.multi_reduction <maximumf>, %246, %cst_78 [2] : vector<2x8x8xf32> to vector<2x8xf32>
    %248 = vector.shape_cast %247 : vector<2x8xf32> to vector<2x8x1xf32>
    %249 = vector.broadcast %248 : vector<2x8x1xf32> to vector<2x8x8xf32>
    %250 = arith.subf %246, %249 : vector<2x8x8xf32>
    %251 = math.exp %250 : vector<2x8x8xf32>
    %cst_79 = arith.constant dense<0.000000e+00> : vector<2x8xf32>
    %252 = vector.multi_reduction <add>, %251, %cst_79 [2] : vector<2x8x8xf32> to vector<2x8xf32>
    %253 = vector.shape_cast %252 : vector<2x8xf32> to vector<2x8x1xf32>
    %254 = tpu.reciprocal %253 {approx = true} : vector<2x8x1xf32> -> vector<2x8x1xf32>
    %255 = arith.mulf %253, %254 : vector<2x8x1xf32>
    %cst_80 = arith.constant 2.000000e+00 : f32
    %256 = vector.broadcast %cst_80 : f32 to vector<2x8x1xf32>
    %257 = arith.subf %256, %255 : vector<2x8x1xf32>
    %258 = arith.mulf %254, %257 : vector<2x8x1xf32>
    %259 = vector.broadcast %258 : vector<2x8x1xf32> to vector<2x8x8xf32>
    %260 = arith.mulf %251, %259 : vector<2x8x8xf32>
    %261 = vector.extract_strided_slice %187 {offsets = [0, 0, 16], sizes = [2, 8, 8], strides = [1, 1, 1]} : vector<2x8x32xf32> to vector<2x8x8xf32>
    "tpu.trace_start"() <{level = 10 : i32, message = "bts,bsd->btd"}> : () -> ()
    %cst_81 = arith.constant dense<0.000000e+00> : vector<2x8x8xf32>
    %262 = tpu.matmul %260, %261, %cst_81 {dimension_numbers = #tpu.dot_dimension_numbers<[2], [1], [1], [2], [0, 0, 0, 1, 1, 2], [0], [0]>} : vector<2x8x8xf32>, vector<2x8x8xf32>, vector<2x8x8xf32> -> vector<2x8x8xf32>
    "tpu.trace_stop"() : () -> ()
    %263 = vector.extract_strided_slice %185 {offsets = [0, 0, 24], sizes = [2, 8, 8], strides = [1, 1, 1]} : vector<2x8x32xf32> to vector<2x8x8xf32>
    %264 = vector.extract_strided_slice %186 {offsets = [0, 0, 24], sizes = [2, 8, 8], strides = [1, 1, 1]} : vector<2x8x32xf32> to vector<2x8x8xf32>
    "tpu.trace_start"() <{level = 10 : i32, message = "btd,bsd->bts"}> : () -> ()
    %cst_82 = arith.constant dense<0.000000e+00> : vector<2x8x8xf32>
    %265 = tpu.matmul %263, %264, %cst_82 {dimension_numbers = #tpu.dot_dimension_numbers<[2], [2], [1], [1], [0, 0, 0, 1, 1, 1], [0], [0]>} : vector<2x8x8xf32>, vector<2x8x8xf32>, vector<2x8x8xf32> -> vector<2x8x8xf32>
    "tpu.trace_stop"() : () -> ()
    %cst_83 = arith.constant 0.176776692 : f32
    %266 = vector.broadcast %cst_83 : f32 to vector<2x8x8xf32>
    %267 = arith.mulf %265, %266 : vector<2x8x8xf32>
    %cst_84 = arith.constant -1.000000e+30 : f32
    %268 = vector.shape_cast %5 : vector<1x8x8xi1> to vector<1x8x8xi1>
    %269 = vector.broadcast %268 : vector<1x8x8xi1> to vector<2x8x8xi1>
    %270 = vector.broadcast %cst_84 : f32 to vector<2x8x8xf32>
    %271 = arith.select %269, %267, %270 : vector<2x8x8xi1>, vector<2x8x8xf32>
    %cst_85 = arith.constant dense<0xFF800000> : vector<2x8xf32>
    %272 = vector.multi_reduction <maximumf>, %271, %cst_85 [2] : vector<2x8x8xf32> to vector<2x8xf32>
    %273 = vector.shape_cast %272 : vector<2x8xf32> to vector<2x8x1xf32>
    %274 = vector.broadcast %273 : vector<2x8x1xf32> to vector<2x8x8xf32>
    %275 = arith.subf %271, %274 : vector<2x8x8xf32>
    %276 = math.exp %275 : vector<2x8x8xf32>
    %cst_86 = arith.constant dense<0.000000e+00> : vector<2x8xf32>
    %277 = vector.multi_reduction <add>, %276, %cst_86 [2] : vector<2x8x8xf32> to vector<2x8xf32>
    %278 = vector.shape_cast %277 : vector<2x8xf32> to vector<2x8x1xf32>
    %279 = tpu.reciprocal %278 {approx = true} : vector<2x8x1xf32> -> vector<2x8x1xf32>
    %280 = arith.mulf %278, %279 : vector<2x8x1xf32>
    %cst_87 = arith.constant 2.000000e+00 : f32
    %281 = vector.broadcast %cst_87 : f32 to vector<2x8x1xf32>
    %282 = arith.subf %281, %280 : vector<2x8x1xf32>
    %283 = arith.mulf %279, %282 : vector<2x8x1xf32>
    %284 = vector.broadcast %283 : vector<2x8x1xf32> to vector<2x8x8xf32>
    %285 = arith.mulf %276, %284 : vector<2x8x8xf32>
    %286 = vector.extract_strided_slice %187 {offsets = [0, 0, 24], sizes = [2, 8, 8], strides = [1, 1, 1]} : vector<2x8x32xf32> to vector<2x8x8xf32>
    "tpu.trace_start"() <{level = 10 : i32, message = "bts,bsd->btd"}> : () -> ()
    %cst_88 = arith.constant dense<0.000000e+00> : vector<2x8x8xf32>
    %287 = tpu.matmul %285, %286, %cst_88 {dimension_numbers = #tpu.dot_dimension_numbers<[2], [1], [1], [2], [0, 0, 0, 1, 1, 2], [0], [0]>} : vector<2x8x8xf32>, vector<2x8x8xf32>, vector<2x8x8xf32> -> vector<2x8x8xf32>
    "tpu.trace_stop"() : () -> ()
    %288 = tpu.concatenate %212, %237, %262, %287 in 2 : vector<2x8x8xf32>, vector<2x8x8xf32>, vector<2x8x8xf32>, vector<2x8x8xf32> -> vector<2x8x32xf32>
    %289 = vector.shape_cast %288 : vector<2x8x32xf32> to vector<16x32xf32>
    %c0_89 = arith.constant 0 : index
    %c224 = arith.constant 224 : index
    %290 = vector.load %arg2[%c0_89, %c224] : memref<32x320xf32, #tpu.memory_space<vmem>>, vector<32x32xf32>
    %cst_90 = arith.constant dense<0.000000e+00> : vector<16x32xf32>
    %291 = tpu.matmul %289, %290, %cst_90 {dimension_numbers = #tpu.dot_dimension_numbers<[1], [0], [0], [1], [0, 0, 1, 1], [], []>} : vector<16x32xf32>, vector<32x32xf32>, vector<16x32xf32> -> vector<16x32xf32>
    %c0_91 = arith.constant 0 : index
    %c224_92 = arith.constant 224 : index
    %292 = vector.load %arg3[%c0_91, %c224_92] : memref<1x512xf32, #tpu.memory_space<vmem>>, vector<1x32xf32>
    %293 = vector.broadcast %292 : vector<1x32xf32> to vector<16x32xf32>
    %294 = arith.addf %291, %293 : vector<16x32xf32>
    %295 = arith.addf %148, %294 : vector<16x32xf32>
    %c0_93 = arith.constant 0 : index
    %c448 = arith.constant 448 : index
    %296 = vector.load %arg3[%c0_93, %c448] : memref<1x512xf32, #tpu.memory_space<vmem>>, vector<1x32xf32>
    %c0_94 = arith.constant 0 : index
    %c480 = arith.constant 480 : index
    %297 = vector.load %arg3[%c0_94, %c480] : memref<1x512xf32, #tpu.memory_space<vmem>>, vector<1x32xf32>
    %cst_95 = arith.constant dense<0.000000e+00> : vector<16xf32>
    %298 = vector.multi_reduction <add>, %295, %cst_95 [1] : vector<16x32xf32> to vector<16xf32>
    %299 = vector.shape_cast %298 : vector<16xf32> to vector<16x1xf32>
    %cst_96 = arith.constant 3.200000e+01 : f32
    %300 = vector.broadcast %cst_96 : f32 to vector<16x1xf32>
    %301 = arith.divf %299, %300 : vector<16x1xf32>
    %302 = vector.broadcast %301 : vector<16x1xf32> to vector<16x32xf32>
    %303 = arith.subf %295, %302 : vector<16x32xf32>
    %304 = arith.mulf %303, %303 : vector<16x32xf32>
    %cst_97 = arith.constant dense<0.000000e+00> : vector<16xf32>
    %305 = vector.multi_reduction <add>, %304, %cst_97 [1] : vector<16x32xf32> to vector<16xf32>
    %306 = vector.shape_cast %305 : vector<16xf32> to vector<16x1xf32>
    %cst_98 = arith.constant 3.200000e+01 : f32
    %307 = vector.broadcast %cst_98 : f32 to vector<16x1xf32>
    %308 = arith.divf %306, %307 : vector<16x1xf32>
    %309 = vector.broadcast %301 : vector<16x1xf32> to vector<16x32xf32>
    %310 = arith.subf %295, %309 : vector<16x32xf32>
    %cst_99 = arith.constant 9.99999974E-6 : f32
    %311 = vector.broadcast %cst_99 : f32 to vector<16x1xf32>
    %312 = arith.addf %308, %311 : vector<16x1xf32>
    %313 = math.rsqrt %312 : vector<16x1xf32>
    %314 = vector.broadcast %313 : vector<16x1xf32> to vector<16x32xf32>
    %315 = arith.mulf %310, %314 : vector<16x32xf32>
    %316 = vector.broadcast %296 : vector<1x32xf32> to vector<16x32xf32>
    %317 = arith.mulf %315, %316 : vector<16x32xf32>
    %318 = vector.broadcast %297 : vector<1x32xf32> to vector<16x32xf32>
    %319 = arith.addf %317, %318 : vector<16x32xf32>
    %c0_100 = arith.constant 0 : index
    %c256 = arith.constant 256 : index
    %320 = vector.load %arg2[%c0_100, %c256] : memref<32x320xf32, #tpu.memory_space<vmem>>, vector<32x32xf32>
    %cst_101 = arith.constant dense<0.000000e+00> : vector<16x32xf32>
    %321 = tpu.matmul %319, %320, %cst_101 {dimension_numbers = #tpu.dot_dimension_numbers<[1], [0], [0], [1], [0, 0, 1, 1], [], []>} : vector<16x32xf32>, vector<32x32xf32>, vector<16x32xf32> -> vector<16x32xf32>
    %c0_102 = arith.constant 0 : index
    %c256_103 = arith.constant 256 : index
    %322 = vector.load %arg3[%c0_102, %c256_103] : memref<1x512xf32, #tpu.memory_space<vmem>>, vector<1x32xf32>
    %323 = vector.broadcast %322 : vector<1x32xf32> to vector<16x32xf32>
    %324 = arith.addf %321, %323 : vector<16x32xf32>
    %cst_104 = arith.constant 0.000000e+00 : f32
    %325 = vector.broadcast %cst_104 : f32 to vector<16x32xf32>
    %326 = arith.maximumf %324, %325 : vector<16x32xf32>
    %c0_105 = arith.constant 0 : index
    %c288 = arith.constant 288 : index
    %327 = vector.load %arg2[%c0_105, %c288] : memref<32x320xf32, #tpu.memory_space<vmem>>, vector<32x32xf32>
    %cst_106 = arith.constant dense<0.000000e+00> : vector<16x32xf32>
    %328 = tpu.matmul %326, %327, %cst_106 {dimension_numbers = #tpu.dot_dimension_numbers<[1], [0], [0], [1], [0, 0, 1, 1], [], []>} : vector<16x32xf32>, vector<32x32xf32>, vector<16x32xf32> -> vector<16x32xf32>
    %c0_107 = arith.constant 0 : index
    %c288_108 = arith.constant 288 : index
    %329 = vector.load %arg3[%c0_107, %c288_108] : memref<1x512xf32, #tpu.memory_space<vmem>>, vector<1x32xf32>
    %330 = vector.broadcast %329 : vector<1x32xf32> to vector<16x32xf32>
    %331 = arith.addf %328, %330 : vector<16x32xf32>
    %332 = arith.addf %331, %295 : vector<16x32xf32>
    %c0_109 = arith.constant 0 : index
    %c0_110 = arith.constant 0 : index
    %333 = vector.load %arg4[%c0_109, %c0_110] : memref<16x32xf32, #tpu.memory_space<vmem>>, vector<16x32xf32>
    tpu.vector_store %arg4[%c0_109, %c0_110], %332 {strides = array<i32>} : memref<16x32xf32, #tpu.memory_space<vmem>>, vector<16x32xf32>,
    return
  }
}

</mosaic_0001>

<bundles_post_ra>
// kernel: decoder_block.1
= control target key start
LH: loop header
LB: loop body
LE: loop exit
PB: predicated region body
PF: predicated region fallthrough
CT: control target
= control target key end

     0   :  { %9 = vsyncpa [#allocation3], 0  ;;  %s5000_s0 = inlined_call_operand.hbm [shape: f32[16,32], index: 0, kind: input, shape index: {}]   ;;  %s5001_s1 = inlined_call_operand.hbm [shape: f32[16,32], index: 1, kind: input, shape index: {}]   ;;  %s5002_s2 = inlined_call_operand.hbm [shape: f32[32,320], index: 2, kind: input, shape index: {}]   ;;  %s5003_s3 = inlined_call_operand.vmem [shape: f32[1,512], index: 3, kind: input, shape index: {}]   ;;  %s5004_s4 = inlined_call_operand.hbm [shape: f32[16,32], index: 4, kind: output, shape index: {}]  }
   0x1   :  { %10 = vsyncpa [#allocation6], 0 }
   0x2   :  { %11 = vsyncpa [#allocation4], 0  ;;  %s4399_s15 = smov [#allocation5]   ;;  %s4400_s17 = smov [#allocation2]  }
   0x3   :  { %s29_s16 = sshll.u32 %s4399_s15, 4  ;;  %s17_s18 = sshll.u32 %s4400_s17, 4  ;;  %s30_s16 = int_to_ptr.vmem [resolvable:$true] %s29_s16  ;;  %s4447_s18 = int_to_ptr.vmem [resolvable:$true] %s17_s18 }
   0x4   :  { %s4305_s21 = scalar_lea.hbm %s5001_s1, 256 }
   0x5   :  { %p4306_p0 = scmp.ne.s32.totalorder %s5001_s1, %s4305_s21  ;;  %p4309_p1 = scmp.lt.u32.totalorder %s4305_s21, %s5001_s1 }
   0x7   :  { %p4311_p2 = pnand %p4309_p1, %p4306_p0 }
   0x9   :  { %4314 = shalt.err (!%p4311_p2)
}
   0xa   :  { %s4315_s26 = scalar_lea.vmem %s30_s16, 256  ;;  %p4320_p4 = scmp.lt.s32.totalorder %s30_s16, %s30_s16 }
   0xb   :  { %p4316_p3 = scmp.ne.s32.totalorder %s30_s16, %s4315_s26  ;;  %p4321_p5 = scmp.lt.s32.totalorder %s4315_s26, %s4315_s26 }
   0xd   :  { %p4322_p6 = por %p4321_p5, %p4320_p4 }
   0xf   :  { %p4323_p7 = pnand %p4322_p6, %p4316_p3 }
  0x11   :  { %4326 = shalt.err (!%p4323_p7)
}
  0x12   :  { %s4401_s27 = smov 128   ;;  %s4402_s28 = smov 8  }
  0x13   :  { %35 = dma.hbm_to_vmem [thread:$0]  %s5001_s1, 256, %s30_s16, [#allocation6], %s4401_s27, %s4401_s27, %s4402_s28  }
  0x14   :  { %s4327_s7 = scalar_lea.hbm %s5000_s0, 256 }
  0x15   :  { %p4328_p8 = scmp.ne.s32.totalorder %s5000_s0, %s4327_s7  ;;  %p4331_p9 = scmp.lt.u32.totalorder %s4327_s7, %s5000_s0 }
  0x17   :  { %p4333_p10 = pnand %p4331_p9, %p4328_p8 }
  0x19   :  { %4336 = shalt.err (!%p4333_p10)
}
  0x1a   :  { %s4337_s12 = scalar_lea.vmem %s4447_s18, 256  ;;  %p4342_p12 = scmp.lt.s32.totalorder %s4447_s18, %s4447_s18 }
  0x1b   :  { %p4338_p11 = scmp.ne.s32.totalorder %s4447_s18, %s4337_s12  ;;  %p4343_p13 = scmp.lt.s32.totalorder %s4337_s12, %s4337_s12 }
  0x1d   :  { %p4344_p0 = por %p4343_p13, %p4342_p12 }
  0x1f   :  { %p4345_p1 = pnand %p4344_p0, %p4338_p11 }
  0x21   :  { %4348 = shalt.err (!%p4345_p1)
}
  0x22   :  { %23 = dma.hbm_to_vmem [thread:$0]  %s5000_s0, 256, %s4447_s18, [#allocation3], %s4401_s27, %s4401_s27, %s4402_s28  }
  0x23   :  { %s4403_s14 = smov [#allocation7]   ;;  %s4349_s19 = scalar_lea.hbm %s5002_s2, 1536 }
  0x24   :  { %s41_s15 = sshll.u32 %s4403_s14, 4  ;;  %p4350_p2 = scmp.ne.s32.totalorder %s5002_s2, %s4349_s19  ;;  %s42_s15 = int_to_ptr.vmem [resolvable:$true] %s41_s15 }
  0x25   :  { %p4353_p3 = scmp.lt.u32.totalorder %s4349_s19, %s5002_s2 }
  0x27   :  { %p4355_p4 = pnand %p4353_p3, %p4350_p2 }
  0x29   :  { %4358 = shalt.err (!%p4355_p4)
}
  0x2a   :  { %s4359_s24 = scalar_lea.vmem %s42_s15, 1536  ;;  %p4364_p6 = scmp.lt.s32.totalorder %s42_s15, %s42_s15 }
  0x2b   :  { %p4360_p5 = scmp.ne.s32.totalorder %s42_s15, %s4359_s24  ;;  %p4365_p7 = scmp.lt.s32.totalorder %s4359_s24, %s4359_s24 }
  0x2d   :  { %p4366_p8 = por %p4365_p7, %p4364_p6 }
  0x2f   :  { %p4367_p9 = pnand %p4366_p8, %p4360_p5 }
  0x31   :  { %4370 = shalt.err (!%p4367_p9)
}
  0x32   :  { %s4404_s0 = smov 384   ;;  %s4405_s18 = smov 24  }
  0x33   :  { %47 = dma.hbm_to_vmem [thread:$0]  %s5002_s2, 1536, %s42_s15, [#allocation6], %s4404_s0, %s4404_s0, %s4405_s18  }
  0x34   :  { %4393 = dma.done.wait [#allocation3], 256  }
  0x35   :  { %4394 = vsyncadd [#allocation3], 4294967040 }
  0x36   :  { %4395 = dma.done.wait [#allocation6], 1792  }
  0x37   :  { %4396 = vsyncadd [#allocation6], 4294965504  ;;  %vm69_vm0 = vcmask 261120   ;;  %v4497_v0 = vld [vmem:[#allocation2] sm:$0xff]  ;;  %v4499_v1 = vld [vmem:[#allocation2 + $0x8] sm:$0xff]  ;;  %s4406_s2 = smov 64   ;;  %v63_v45 = vlaneseq }
  0x38   :  { %v70_v2 = vsel %vm69_vm0, %v4497_v0, 0.0  ;;  %v73_v3 = vsel %vm69_vm0, %v4499_v1, 0.0  ;;  %v3697_v4 = vld [vmem:[%s5003_s3 + $0x2] ss:$0 sm:$0xff]  ;;  %s4407_s5 = smov 32   ;;  %v4516_v16 = vld [vmem:[#allocation7 + $0x18] sm:$0xff] }
  0x39   :  { %71 = vadd.xlane.f32.xlu0 %v70_v2  ;;  %v4514_v15 = vld [vmem:[#allocation7] sm:$0xff]  ;;  %v4520_v18 = vld [vmem:[#allocation7 + $0x30] sm:$0xff]  ;;  %v4522_v19 = vld [vmem:[#allocation7 + $0x48] sm:$0xff]  ;;  %v4408_v37 = vmov 0.0   ;;  %vm4409_vm1 = vmmov 0   ;;  %s4410_s8 = smov 96  }
  0x3a   :  { %v4110_v17 = vpack.c.bf16 %v4516_v16, %v4514_v15  ;;  %v4114_v20 = vpack.c.bf16 %v4522_v19, %v4520_v18  ;;  %3884 = vmatprep.subr.mxu1 %v4408_v37  ;;  %3886 = vmatprep.mubr.msk.f32.mxu1 %vm4409_vm1, %v4408_v37  ;;  %v4537_v38 = vld [vmem:[%s5003_s3] ss:$0 sm:$0xff]  ;;  %vm207_vm2 = vcmask 64512   ;;  %v64_v46 = vshrl.u32 %v63_v45, 7  ;;  %s4411_s9 = smov 88   ;;  %s4412_s10 = smov 120  }
  0x3b   :  { %v66_v47 = vand.u32 127, %v63_v45  ;;  %s4413_s11 = smov 56   ;;  %s4414_s12 = smov 80   ;;  %vm1594_vm4 = vcmask 195584   ;;  %vm1591_vm5 = vcmask 130048  }
  0x3c   :  { %4111 = vmatprep.subr.bf16.mxu0 %v4110_v17  ;;  %s4415_s1 = smov 112   ;;  %s4416_s13 = smov 48  }
  0x3d   :  { %74 = vadd.xlane.f32.xlu0 %v73_v3  ;;  %4113 = vmatpush3.bf16.msra.mxu0 %v4110_v17  ;;  %vm4561_vm3 = vcmp.ge.s32.totalorder %v64_v46, %v66_v47  ;;  %s4417_s14 = smov 72   ;;  %s4418_s15 = smov 104  }
  0x3e   :  { %4115 = vmatprep.subr.bf16.mxu0 %v4114_v20  ;;  %s4419_s16 = smov 40   ;;  %s4420_s17 = smov 16  }
  0x3f   :  { %s4421_s0 = smov [#allocation8]  }
  0x41   :  { %4117 = vmatpush3.bf16.msra.mxu0 %v4114_v20 }
  0x42   :  { %3904 = vmatprep.subr.mxu0 %v4408_v37 }
  0x53   :  { %102 = vrot.lane.b32.xlu0 %v3697_v4, %s4406_s2 }
  0xc6   :  { %v72_v5 = vpop.xlane.xlu0 %71 }
  0xc7   :  { %v77_v6 = vmul.f32 0.03125, %v72_v5 }
  0xc9   :  { %v79_v7 = vsub.f32 %v4497_v0, %v77_v6 }
  0xca   :  { %v75_v8 = vpop.xlane.xlu0 %74 }
  0xcb   :  { %v78_v9 = vmul.f32 0.03125, %v75_v8  ;;  %v81_v10 = vmul.f32 %v79_v7, %v79_v7 }
  0xcd   :  { %v80_v11 = vsub.f32 %v4499_v1, %v78_v9  ;;  %v83_v12 = vsel %vm69_vm0, %v81_v10, 0.0 }
  0xce   :  { %84 = vadd.xlane.f32.xlu1 %v83_v12  ;;  %v103_v28 = vpop.permute.xlu0 %102 }
  0xcf   :  { %v82_v13 = vmul.f32 %v80_v11, %v80_v11 }
  0xd1   :  { %v86_v14 = vsel %vm69_vm0, %v82_v13, 0.0 }
  0xd2   :  { %87 = vadd.xlane.f32.xlu1 %v86_v14 }
  0xe3   :  { %107 = vrot.lane.b32.xlu1 %v3697_v4, %s4407_s5 }
 0x15b   :  { %v85_v21 = vpop.xlane.xlu1 %84 }
 0x15c   :  { %v89_v22 = vmul.f32 0.03125, %v85_v21 }
 0x15e   :  { %v91_v23 = vadd.f32 1e-05, %v89_v22 }
 0x15f   :  { %v88_v24 = vpop.xlane.xlu1 %87 }
 0x160   :  { %4229 = vrsqrt.f32 %v91_v23  ;;  %v90_v25 = vmul.f32 0.03125, %v88_v24 }
 0x162   :  { %v92_v26 = vadd.f32 1e-05, %v90_v25 }
 0x163   :  { %v108_v30 = vpop.permute.xlu1 %107 }
 0x164   :  { %4231 = vrsqrt.f32 %v92_v26 }
 0x16a   :  { %v4230_v27 = vpop.eup %4229 }
 0x16b   :  { %v95_v29 = vmul.f32 %v4230_v27, %v79_v7 }
 0x16d   :  { %v105_v31 = vmul.f32 %v103_v28, %v95_v29 }
 0x16e   :  { %v4232_v32 = vpop.eup %4231 }
 0x16f   :  { %v96_v33 = vmul.f32 %v4232_v32, %v80_v11  ;;  %v110_v34 = vadd.f32 %v108_v30, %v105_v31 }
 0x171   :  { %v106_v35 = vmul.f32 %v103_v28, %v96_v33  ;;  %3881 = vmatprep.mubr.msk.f32.mxu0 %vm69_vm0, %v110_v34 }
 0x173   :  { %v111_v36 = vadd.f32 %v108_v30, %v106_v35 }
 0x175   :  { %3882 = vmatmul.mubr.msk.f32.vlgmr.msra.gmra.mrb[0].mxu0 %vm69_vm0, %v111_v36 }
 0x176   :  { %3906 = vmatprep.mubr.msk.f32.mxu0 %vm4409_vm1, %v4408_v37 }
 0x248   :  { %v3883_v39 = vpop.f32.mrb[0].mxu0 }
 0x249   :  { %v195_v40 = vpop.f32.mrb[1].mxu0  ;;  %v4545_v42 = vadd.f32 %v3883_v39, %v4537_v38 }
 0x24a   :  { %v4540_v41 = vadd.f32 %v4537_v38, %v195_v40 }
 0x24c   :  { %205 = vrot.lane.b32.xlu1 %v4540_v41, %s4410_s8 }
 0x250   :  { %283 = vrot.lane.b32.xlu1 %v4545_v42, %s4410_s8 }
 0x2be   :  { %v206_v43 = vpop.permute.xlu1 %205 }
 0x2bf   :  { %3885 = vmatpush3.xpose.msk.msra.mxu1 %vm207_vm2, %v206_v43 }
 0x2c0   :  { %3889 = vmatprep.subr.mxu1 %v4408_v37 }
 0x2c2   :  { %3887 = vmatmul.mubr.msk.f32.vlgmr.msra.gmra.mrb[0].mxu1 %vm207_vm2, %v4540_v41  ;;  %v284_v44 = vpop.permute.xlu1 %283 }
 0x2c3   :  { %3890 = vmatpush3.xpose.msk.msra.mxu1 %vm207_vm2, %v284_v44  ;;  %3891 = vmatprep.mubr.msk.f32.mxu1 %vm4409_vm1, %v4408_v37 }
 0x2c4   :  { %3894 = vmatprep.subr.mxu1 %v4408_v37 }
 0x2c6   :  { %3892 = vmatmul.mubr.msk.f32.vlgmr.msra.gmra.mrb[2].mxu1 %vm207_vm2, %v4545_v42 }
 0x2c7   :  { %3896 = vmatprep.mubr.msk.f32.mxu1 %vm4409_vm1, %v4408_v37 }
 0x395   :  { %v278_v48 = vpop.f32.mrb[0].mxu1 }
 0x396   :  { %v359_v50 = vmul.f32 0.17677669, %v278_v48  ;;  %v3888_v51 = vpop.f32.mrb[1].mxu1 }
 0x398   :  { %v363_v52 = vsel %vm4561_vm3, %v359_v50, -1e+30 }
 0x399   :  { %v355_v53 = vpop.f32.mrb[2].mxu1  ;;  %v365_v54 = vsel %vm207_vm2, %v363_v52, -inf }
 0x39a   :  { %v360_v55 = vmul.f32 0.17677669, %v355_v53  ;;  %366 = vmax.xlane.f32.xlu0 %v365_v54  ;;  %v3893_v56 = vpop.f32.mrb[3].mxu1 }
 0x39c   :  { %v364_v57 = vsel %vm4561_vm3, %v360_v55, -1e+30 }
 0x39d   :  { %v368_v58 = vsel %vm207_vm2, %v364_v57, -inf }
 0x39e   :  { %369 = vmax.xlane.f32.xlu1 %v368_v58 }
 0x3af   :  { %469 = vrot.lane.b32.xlu1 %v4545_v42, %s4406_s2 }
 0x3b3   :  { %547 = vrot.lane.b32.xlu1 %v4540_v41, %s4411_s9 }
 0x3b7   :  { %625 = vrot.lane.b32.xlu1 %v4545_v42, %s4411_s9 }
 0x3bb   :  { %623 = vrot.lane.b32.xlu1 %v4545_v42, %s4412_s10 }
 0x427   :  { %v367_v59 = vpop.xlane.xlu0 %366 }
 0x428   :  { %v371_v60 = vsub.f32 %v363_v52, %v367_v59 }
 0x42a   :  { %v373_v61 = vmul.f32 1.442695, %v371_v60 }
 0x42b   :  { %v370_v62 = vpop.xlane.xlu1 %369 }
 0x42c   :  { %4233 = vpow2.f32 %v373_v61  ;;  %v372_v63 = vsub.f32 %v364_v57, %v370_v62 }
 0x42e   :  { %v375_v2 = vmul.f32 1.442695, %v372_v63 }
 0x42f   :  { %v470_v3 = vpop.permute.xlu1 %469 }
 0x430   :  { %4235 = vpow2.f32 %v375_v2 }
 0x433   :  { %v548_v4 = vpop.permute.xlu1 %547 }
 0x434   :  { %3905 = vmatpush3.xpose.msk.msra.mxu0 %vm207_vm2, %v548_v4 }
 0x435   :  { %3914 = vmatprep.subr.mxu0 %v4408_v37 }
 0x436   :  { %v4234_v5 = vpop.eup %4233 }
 0x437   :  { %v377_v6 = vsel %vm207_vm2, %v4234_v5, 0.0  ;;  %v626_v27 = vpop.permute.xlu1 %625 }
 0x438   :  { %378 = vadd.xlane.f32.xlu0 %v377_v6 }
 0x43a   :  { %v4236_v7 = vpop.eup %4235 }
 0x43b   :  { %v380_v8 = vsel %vm207_vm2, %v4236_v7, 0.0  ;;  %v624_v28 = vpop.permute.xlu1 %623 }
 0x43c   :  { %381 = vadd.xlane.f32.xlu0 %v380_v8 }
 0x452   :  { %393 = vrot.lane.b32.xlu0 %v4540_v41, %s4406_s2 }
 0x456   :  { %545 = vrot.lane.b32.xlu0 %v4540_v41, %s4412_s10 }
 0x4c5   :  { %v379_v9 = vpop.xlane.xlu0 %378 }
 0x4c6   :  { %4237 = vrcp.f32 %v379_v9 }
 0x4c9   :  { %v382_v10 = vpop.xlane.xlu0 %381 }
 0x4ca   :  { %4239 = vrcp.f32 %v382_v10 }
 0x4cd   :  { %v394_v11 = vpop.permute.xlu0 %393 }
 0x4ce   :  { %3895 = vmatpush3.msra.mxu1 %v394_v11 }
 0x4cf   :  { %3899 = vmatprep.subr.mxu1 %v4408_v37 }
 0x4d0   :  { %v4238_v12 = vpop.eup %4237 }
 0x4d1   :  { %v385_v13 = vmul.f32 %v4238_v12, %v379_v9  ;;  %v546_v14 = vpop.permute.xlu0 %545 }
 0x4d2   :  { %3907 = vmatmul.mubr.msk.f32.vlgmr.msra.gmra.mrb[2].mxu0 %vm207_vm2, %v546_v14 }
 0x4d3   :  { %v387_v17 = vsub.f32 2.0, %v385_v13  ;;  %3916 = vmatprep.mubr.msk.f32.mxu0 %vm4409_vm1, %v4408_v37 }
 0x4d4   :  { %v4240_v20 = vpop.eup %4239 }
 0x4d5   :  { %v389_v21 = vmul.f32 %v4238_v12, %v387_v17  ;;  %v386_v22 = vmul.f32 %v4240_v20, %v382_v10 }
 0x4d7   :  { %v391_v23 = vmul.f32 %v4234_v5, %v389_v21  ;;  %v388_v24 = vsub.f32 2.0, %v386_v22 }
 0x4d9   :  { %v390_v25 = vmul.f32 %v4240_v20, %v388_v24  ;;  %3897 = vmatmul.mubr.msk.f32.vlgmr.msra.gmra.mrb[4].mxu1 %vm207_vm2, %v391_v23 }
 0x4da   :  { %3900 = vmatpush3.msra.mxu1 %v470_v3  ;;  %3901 = vmatprep.mubr.msk.f32.mxu1 %vm4409_vm1, %v4408_v37 }
 0x4db   :  { %v392_v26 = vmul.f32 %v4236_v7, %v390_v25  ;;  %3909 = vmatprep.subr.mxu1 %v4408_v37 }
 0x4dd   :  { %3902 = vmatmul.mubr.msk.f32.vlgmr.msra.gmra.mrb[6].mxu1 %vm207_vm2, %v392_v26 }
 0x4de   :  { %3911 = vmatprep.mubr.msk.f32.mxu1 %vm4409_vm1, %v4408_v37 }
 0x4e1   :  { %3910 = vmatpush3.xpose.msk.msra.mxu1 %vm207_vm2, %v626_v27 }
 0x4e2   :  { %3919 = vmatprep.subr.mxu1 %v4408_v37 }
 0x4e4   :  { %3912 = vmatmul.mubr.msk.f32.vlgmr.msra.gmra.mrb[8].mxu1 %vm207_vm2, %v624_v28 }
 0x4e5   :  { %3921 = vmatprep.mubr.msk.f32.mxu1 %vm4409_vm1, %v4408_v37 }
 0x5a5   :  { %v619_v29 = vpop.f32.mrb[2].mxu0 }
 0x5a6   :  { %v701_v30 = vmul.f32 0.17677669, %v619_v29  ;;  %v3908_v31 = vpop.f32.mrb[3].mxu0 }
 0x5a8   :  { %v703_v32 = vsel %vm4561_vm3, %v701_v30, -1e+30 }
 0x5a9   :  { %v705_v33 = vsel %vm207_vm2, %v703_v32, -inf }
 0x5aa   :  { %706 = vmax.xlane.f32.xlu0 %v705_v33 }
 0x5ac   :  { %v4606_v34 = vpop.f32.mrb[4].mxu1 }
 0x5ad   :  { %v3898_v35 = vpop.f32.mrb[5].mxu1 }
 0x5b0   :  { %v4608_v36 = vpop.f32.mrb[6].mxu1 }
 0x5b1   :  { %v3903_v39 = vpop.f32.mrb[7].mxu1 }
 0x5b7   :  { %v697_v40 = vpop.f32.mrb[8].mxu1 }
 0x5b8   :  { %v702_v43 = vmul.f32 0.17677669, %v697_v40  ;;  %v3913_v44 = vpop.f32.mrb[9].mxu1 }
 0x5ba   :  { %v704_v45 = vsel %vm4561_vm3, %v702_v43, -1e+30 }
 0x5bb   :  { %v708_v46 = vsel %vm207_vm2, %v704_v45, -inf }
 0x5bc   :  { %709 = vmax.xlane.f32.xlu1 %v708_v46 }
 0x5cd   :  { %809 = vrot.lane.b32.xlu1 %v4545_v42, %s4413_s11 }
 0x5d1   :  { %887 = vrot.lane.b32.xlu1 %v4540_v41, %s4414_s12 }
 0x5d5   :  { %965 = vrot.lane.b32.xlu1 %v4545_v42, %s4414_s12 }
 0x5d9   :  { %963 = vrot.lane.b32.xlu1 %v4545_v42, %s4415_s1 }
 0x637   :  { %v707_v47 = vpop.xlane.xlu0 %706 }
 0x638   :  { %v711_v48 = vsub.f32 %v703_v32, %v707_v47 }
 0x63a   :  { %v713_v50 = vmul.f32 1.442695, %v711_v48 }
 0x63c   :  { %4241 = vpow2.f32 %v713_v50 }
 0x646   :  { %v4242_v51 = vpop.eup %4241 }
 0x647   :  { %v717_v52 = vsel %vm207_vm2, %v4242_v51, 0.0 }
 0x648   :  { %718 = vadd.xlane.f32.xlu0 %v717_v52 }
 0x649   :  { %v710_v53 = vpop.xlane.xlu1 %709 }
 0x64a   :  { %v712_v54 = vsub.f32 %v704_v45, %v710_v53 }
 0x64c   :  { %v715_v55 = vmul.f32 1.442695, %v712_v54 }
 0x64d   :  { %v810_v56 = vpop.permute.xlu1 %809 }
 0x64e   :  { %4243 = vpow2.f32 %v715_v55  ;;  %3920 = vmatpush3.msra.mxu1 %v810_v56 }
 0x64f   :  { %3929 = vmatprep.subr.mxu1 %v4408_v37 }
 0x651   :  { %v888_v6 = vpop.permute.xlu1 %887 }
 0x655   :  { %v966_v11 = vpop.permute.xlu1 %965 }
 0x658   :  { %v4244_v57 = vpop.eup %4243 }
 0x659   :  { %v720_v58 = vsel %vm207_vm2, %v4244_v57, 0.0  ;;  %v964_v13 = vpop.permute.xlu1 %963 }
 0x65a   :  { %721 = vadd.xlane.f32.xlu0 %v720_v58 }
 0x670   :  { %733 = vrot.lane.b32.xlu0 %v4540_v41, %s4413_s11 }
 0x674   :  { %885 = vrot.lane.b32.xlu0 %v4540_v41, %s4415_s1 }
 0x6d5   :  { %v719_v59 = vpop.xlane.xlu0 %718 }
 0x6d6   :  { %4245 = vrcp.f32 %v719_v59 }
 0x6e0   :  { %v4246_v60 = vpop.eup %4245 }
 0x6e1   :  { %v725_v61 = vmul.f32 %v4246_v60, %v719_v59 }
 0x6e3   :  { %v727_v62 = vsub.f32 2.0, %v725_v61 }
 0x6e5   :  { %v729_v63 = vmul.f32 %v4246_v60, %v727_v62 }
 0x6e7   :  { %v722_v2 = vpop.xlane.xlu0 %721  ;;  %v731_v3 = vmul.f32 %v4242_v51, %v729_v63 }
 0x6e8   :  { %4247 = vrcp.f32 %v722_v2 }
 0x6eb   :  { %v734_v4 = vpop.permute.xlu0 %733 }
 0x6ec   :  { %3915 = vmatpush3.msra.mxu0 %v734_v4 }
 0x6ed   :  { %3917 = vmatmul.mubr.msk.f32.vlgmr.msra.gmra.mrb[4].mxu0 %vm207_vm2, %v731_v3  ;;  %3924 = vmatprep.subr.mxu0 %v4408_v37 }
 0x6ee   :  { %3926 = vmatprep.mubr.msk.f32.mxu0 %vm4409_vm1, %v4408_v37 }
 0x6ef   :  { %v886_v9 = vpop.permute.xlu0 %885 }
 0x6f2   :  { %v4248_v5 = vpop.eup %4247 }
 0x6f3   :  { %v726_v7 = vmul.f32 %v4248_v5, %v722_v2  ;;  %3925 = vmatpush3.xpose.msk.msra.mxu0 %vm207_vm2, %v888_v6 }
 0x6f4   :  { %3934 = vmatprep.subr.mxu0 %v4408_v37 }
 0x6f5   :  { %v728_v8 = vsub.f32 2.0, %v726_v7 }
 0x6f6   :  { %3927 = vmatmul.mubr.msk.f32.vlgmr.msra.gmra.mrb[6].mxu0 %vm207_vm2, %v886_v9 }
 0x6f7   :  { %v730_v10 = vmul.f32 %v4248_v5, %v728_v8  ;;  %3936 = vmatprep.mubr.msk.f32.mxu0 %vm4409_vm1, %v4408_v37 }
 0x6f9   :  { %v732_v12 = vmul.f32 %v4244_v57, %v730_v10 }
 0x6fb   :  { %3922 = vmatmul.mubr.msk.f32.vlgmr.msra.gmra.mrb[10].mxu1 %vm207_vm2, %v732_v12 }
 0x6fc   :  { %3930 = vmatpush3.xpose.msk.msra.mxu1 %vm207_vm2, %v966_v11  ;;  %3931 = vmatprep.mubr.msk.f32.mxu1 %vm4409_vm1, %v4408_v37 }
 0x6fd   :  { %3939 = vmatprep.subr.mxu1 %v4408_v37 }
 0x6ff   :  { %3932 = vmatmul.mubr.msk.f32.vlgmr.msra.gmra.mrb[12].mxu1 %vm207_vm2, %v964_v13 }
 0x700   :  { %3941 = vmatprep.mubr.msk.f32.mxu1 %vm4409_vm1, %v4408_v37 }
 0x7c0   :  { %v4643_v14 = vpop.f32.mrb[4].mxu0 }
 0x7c1   :  { %v3918_v17 = vpop.f32.mrb[5].mxu0 }
 0x7c9   :  { %v959_v20 = vpop.f32.mrb[6].mxu0 }
 0x7ca   :  { %v1041_v21 = vmul.f32 0.17677669, %v959_v20  ;;  %v3928_v22 = vpop.f32.mrb[7].mxu0 }
 0x7cc   :  { %v1043_v23 = vsel %vm4561_vm3, %v1041_v21, -1e+30 }
 0x7cd   :  { %v1045_v24 = vsel %vm207_vm2, %v1043_v23, -inf }
 0x7ce   :  { %1046 = vmax.xlane.f32.xlu0 %v1045_v24  ;;  %v4648_v25 = vpop.f32.mrb[10].mxu1  ;;  %v4189_v24 = vpack.i.bf16 %v4516_v16, %v4514_v15 }
 0x7cf   :  { %v3923_v26 = vpop.f32.mrb[11].mxu1 }
 0x7d0   :  { %v4194_v26 = vpack.i.bf16 %v4522_v19, %v4520_v18 }
 0x7d2   :  { %v1037_v27 = vpop.f32.mrb[12].mxu1 }
 0x7d3   :  { %v1042_v28 = vmul.f32 0.17677669, %v1037_v27  ;;  %v3933_v29 = vpop.f32.mrb[13].mxu1 }
 0x7d5   :  { %v1044_v30 = vsel %vm4561_vm3, %v1042_v28, -1e+30 }
 0x7d6   :  { %v1048_v31 = vsel %vm207_vm2, %v1044_v30, -inf }
 0x7d7   :  { %1049 = vmax.xlane.f32.xlu1 %v1048_v31 }
 0x7e8   :  { %1149 = vrot.lane.b32.xlu1 %v4545_v42, %s4416_s13 }
 0x7ec   :  { %1227 = vrot.lane.b32.xlu1 %v4540_v41, %s4417_s14 }
 0x7f0   :  { %1305 = vrot.lane.b32.xlu1 %v4545_v42, %s4417_s14 }
 0x7f4   :  { %1303 = vrot.lane.b32.xlu1 %v4545_v42, %s4418_s15 }
 0x85b   :  { %v1047_v32 = vpop.xlane.xlu0 %1046 }
 0x85c   :  { %v1051_v33 = vsub.f32 %v1043_v23, %v1047_v32 }
 0x85e   :  { %v1053_v35 = vmul.f32 1.442695, %v1051_v33 }
 0x860   :  { %4249 = vpow2.f32 %v1053_v35 }
 0x864   :  { %v1050_v39 = vpop.xlane.xlu1 %1049 }
 0x865   :  { %v1052_v40 = vsub.f32 %v1044_v30, %v1050_v39 }
 0x867   :  { %v1055_v43 = vmul.f32 1.442695, %v1052_v40 }
 0x868   :  { %v1150_v44 = vpop.permute.xlu1 %1149 }
 0x869   :  { %4251 = vpow2.f32 %v1055_v43  ;;  %3940 = vmatpush3.msra.mxu1 %v1150_v44 }
 0x86a   :  { %v4250_v45 = vpop.eup %4249  ;;  %3949 = vmatprep.subr.mxu1 %v4408_v37 }
 0x86b   :  { %v1057_v46 = vsel %vm207_vm2, %v4250_v45, 0.0 }
 0x86c   :  { %1058 = vadd.xlane.f32.xlu0 %v1057_v46  ;;  %v1228_v59 = vpop.permute.xlu1 %1227 }
 0x870   :  { %v1306_v2 = vpop.permute.xlu1 %1305 }
 0x873   :  { %v4252_v47 = vpop.eup %4251 }
 0x874   :  { %v1060_v48 = vsel %vm207_vm2, %v4252_v47, 0.0  ;;  %v1304_v4 = vpop.permute.xlu1 %1303 }
 0x875   :  { %1061 = vadd.xlane.f32.xlu0 %v1060_v48 }
 0x88b   :  { %1073 = vrot.lane.b32.xlu0 %v4540_v41, %s4416_s13 }
 0x88f   :  { %1225 = vrot.lane.b32.xlu0 %v4540_v41, %s4418_s15 }
 0x8f9   :  { %v1059_v50 = vpop.xlane.xlu0 %1058 }
 0x8fa   :  { %4253 = vrcp.f32 %v1059_v50 }
 0x902   :  { %v1062_v51 = vpop.xlane.xlu0 %1061 }
 0x903   :  { %4255 = vrcp.f32 %v1062_v51 }
 0x904   :  { %v4254_v52 = vpop.eup %4253 }
 0x905   :  { %v1065_v53 = vmul.f32 %v4254_v52, %v1059_v50 }
 0x906   :  { %v1074_v54 = vpop.permute.xlu0 %1073 }
 0x907   :  { %v1067_v55 = vsub.f32 2.0, %v1065_v53  ;;  %3935 = vmatpush3.msra.mxu0 %v1074_v54 }
 0x908   :  { %3944 = vmatprep.subr.mxu0 %v4408_v37 }
 0x909   :  { %v1069_v56 = vmul.f32 %v4254_v52, %v1067_v55 }
 0x90a   :  { %v1226_v62 = vpop.permute.xlu0 %1225 }
 0x90b   :  { %v1071_v57 = vmul.f32 %v4250_v45, %v1069_v56 }
 0x90d   :  { %v4256_v58 = vpop.eup %4255  ;;  %3937 = vmatmul.mubr.msk.f32.vlgmr.msra.gmra.mrb[8].mxu0 %vm207_vm2, %v1071_v57 }
 0x90e   :  { %v1066_v60 = vmul.f32 %v4256_v58, %v1062_v51  ;;  %3945 = vmatpush3.xpose.msk.msra.mxu0 %vm207_vm2, %v1228_v59  ;;  %3946 = vmatprep.mubr.msk.f32.mxu0 %vm4409_vm1, %v4408_v37 }
 0x90f   :  { %3954 = vmatprep.subr.mxu0 %v4408_v37 }
 0x910   :  { %v1068_v61 = vsub.f32 2.0, %v1066_v60 }
 0x911   :  { %3947 = vmatmul.mubr.msk.f32.vlgmr.msra.gmra.mrb[10].mxu0 %vm207_vm2, %v1226_v62 }
 0x912   :  { %v1070_v63 = vmul.f32 %v4256_v58, %v1068_v61  ;;  %3956 = vmatprep.mubr.msk.f32.mxu0 %vm4409_vm1, %v4408_v37 }
 0x914   :  { %v1072_v3 = vmul.f32 %v4252_v47, %v1070_v63 }
 0x916   :  { %3942 = vmatmul.mubr.msk.f32.vlgmr.msra.gmra.mrb[14].mxu1 %vm207_vm2, %v1072_v3 }
 0x917   :  { %3950 = vmatpush3.xpose.msk.msra.mxu1 %vm207_vm2, %v1306_v2  ;;  %3951 = vmatprep.mubr.msk.f32.mxu1 %vm4409_vm1, %v4408_v37 }
 0x918   :  { %3959 = vmatprep.subr.mxu1 %v4408_v37 }
 0x91a   :  { %3952 = vmatmul.mubr.msk.f32.vlgmr.msra.gmra.mrb[16].mxu1 %vm207_vm2, %v1304_v4 }
 0x91b   :  { %3961 = vmatprep.mubr.msk.f32.mxu1 %vm4409_vm1, %v4408_v37 }
 0x9e0   :  { %v1145_v5 = vpop.f32.mrb[8].mxu0 }
 0x9e1   :  { %v3938_v6 = vpop.f32.mrb[9].mxu0 }
 0x9e4   :  { %v1299_v7 = vpop.f32.mrb[10].mxu0 }
 0x9e5   :  { %v1381_v8 = vmul.f32 0.17677669, %v1299_v7  ;;  %v3948_v9 = vpop.f32.mrb[11].mxu0 }
 0x9e7   :  { %v1383_v10 = vsel %vm4561_vm3, %v1381_v8, -1e+30 }
 0x9e8   :  { %v1385_v11 = vsel %vm207_vm2, %v1383_v10, -inf }
 0x9e9   :  { %1386 = vmax.xlane.f32.xlu0 %v1385_v11  ;;  %v1221_v12 = vpop.f32.mrb[14].mxu1 }
 0x9ea   :  { %v3943_v13 = vpop.f32.mrb[15].mxu1 }
 0x9ed   :  { %v1377_v17 = vpop.f32.mrb[16].mxu1 }
 0x9ee   :  { %v1382_v20 = vmul.f32 0.17677669, %v1377_v17  ;;  %v3953_v21 = vpop.f32.mrb[17].mxu1 }
 0x9f0   :  { %v1384_v22 = vsel %vm4561_vm3, %v1382_v20, -1e+30 }
 0x9f1   :  { %v1388_v23 = vsel %vm207_vm2, %v1384_v22, -inf }
 0x9f2   :  { %1389 = vmax.xlane.f32.xlu1 %v1388_v23  ;;  %v1749_v23 = vld [vmem:[#allocation7 + $0x8] sm:$0xff] }
 0xa03   :  { %1489 = vrot.lane.b32.xlu1 %v4545_v42, %s4419_s16 }
 0xa07   :  { %4190 = vrot.lane.b32.xlu1 %v4189_v24, %s4407_s5  ;;  %v1750_v24 = vld [vmem:[#allocation7 + $0x20] sm:$0xff] }
 0xa0b   :  { %4195 = vrot.lane.b32.xlu1 %v4194_v26, %s4407_s5  ;;  %v4731_v26 = vpack.i.bf16 %v1750_v24, %v1749_v23 }
 0xa0f   :  { %1569 = vrot.lane.b32.xlu1 %v4648_v25, %s4402_s28 }
 0xa13   :  { %1577 = vrot.lane.b32.xlu1 %v1221_v12, %s4420_s17 }
 0xa76   :  { %v1387_v27 = vpop.xlane.xlu0 %1386 }
 0xa77   :  { %v1391_v28 = vsub.f32 %v1383_v10, %v1387_v27 }
 0xa79   :  { %v1393_v29 = vmul.f32 1.442695, %v1391_v28 }
 0xa7b   :  { %4257 = vpow2.f32 %v1393_v29 }
 0xa7f   :  { %v1390_v42 = vpop.xlane.xlu1 %1389 }
 0xa80   :  { %v1392_v30 = vsub.f32 %v1384_v22, %v1390_v42 }
 0xa82   :  { %v1395_v15 = vmul.f32 1.442695, %v1392_v30 }
 0xa83   :  { %v1490_v16 = vpop.permute.xlu1 %1489 }
 0xa84   :  { %4259 = vpow2.f32 %v1395_v15  ;;  %3960 = vmatpush3.msra.mxu1 %v1490_v16 }
 0xa85   :  { %v4258_v31 = vpop.eup %4257 }
 0xa86   :  { %v1397_v18 = vsel %vm207_vm2, %v4258_v31, 0.0 }
 0xa87   :  { %1398 = vadd.xlane.f32.xlu0 %v1397_v18  ;;  %v4191_v33 = vpop.permute.xlu1 %4190 }
 0xa88   :  { %v4193_v35 = vunpack.i.h.bf16 %v4191_v33  ;;  %v4192_v39 = vunpack.i.l.bf16 %v4191_v33 }
 0xa8a   :  { %v4118_v44 = vpack.c.bf16 %v4193_v35, %v4192_v39 }
 0xa8b   :  { %v4196_v46 = vpop.permute.xlu1 %4195 }
 0xa8c   :  { %v4198_v48 = vunpack.i.h.bf16 %v4196_v46  ;;  %v4197_v50 = vunpack.i.l.bf16 %v4196_v46  ;;  %v4755_v46 = vld [vmem:[%s5003_s3 + $0x1] ss:$0 sm:$0xff] }
 0xa8e   :  { %v4260_v19 = vpop.eup %4259  ;;  %v4122_v51 = vpack.c.bf16 %v4198_v48, %v4197_v50 }
 0xa8f   :  { %v1400_v25 = vsel %vm207_vm2, %v4260_v19, 0.0  ;;  %v1570_v2 = vpop.permute.xlu1 %1569 }
 0xa90   :  { %1401 = vadd.xlane.f32.xlu0 %v1400_v25  ;;  %v1590_v7 = vsel %vm207_vm2, %v4608_v36, %v1570_v2  ;;  %v1752_v25 = vld [vmem:[#allocation7 + $0x50] sm:$0xff] }
 0xaa6   :  { %1413 = vrot.lane.b32.xlu0 %v4540_v41, %s4419_s16 }
 0xaaa   :  { %1567 = vrot.lane.b32.xlu0 %v4643_v14, %s4402_s28 }
 0xaae   :  { %1575 = vrot.lane.b32.xlu0 %v1145_v5, %s4420_s17 }
 0xb14   :  { %v1399_v32 = vpop.xlane.xlu0 %1398 }
 0xb15   :  { %4261 = vrcp.f32 %v1399_v32 }
 0xb1d   :  { %v1402_v40 = vpop.xlane.xlu0 %1401 }
 0xb1e   :  { %4263 = vrcp.f32 %v1402_v40 }
 0xb1f   :  { %v4262_v43 = vpop.eup %4261 }
 0xb20   :  { %v1405_v45 = vmul.f32 %v4262_v43, %v1399_v32 }
 0xb21   :  { %v1414_v47 = vpop.permute.xlu0 %1413 }
 0xb22   :  { %v1407_v41 = vsub.f32 2.0, %v1405_v45  ;;  %3955 = vmatpush3.msra.mxu0 %v1414_v47 }
 0xb23   :  { %4119 = vmatprep.subr.bf16.mxu0 %v4118_v44 }
 0xb24   :  { %v1409_v14 = vmul.f32 %v4262_v43, %v1407_v41 }
 0xb25   :  { %v1568_v62 = vpop.permute.xlu0 %1567 }
 0xb26   :  { %v1411_v52 = vmul.f32 %v4258_v31, %v1409_v14  ;;  %v1589_v3 = vsel %vm207_vm2, %v4606_v34, %v1568_v62 }
 0xb28   :  { %v4264_v53 = vpop.eup %4263  ;;  %3957 = vmatmul.mubr.msk.f32.vlgmr.msra.gmra.mrb[12].mxu0 %vm207_vm2, %v1411_v52 }
 0xb29   :  { %v1406_v54 = vmul.f32 %v4264_v53, %v1402_v40  ;;  %4121 = vmatpush3.bf16.msra.mxu0 %v4118_v44  ;;  %v1576_v63 = vpop.permute.xlu0 %1575  ;;  %v4126_v40 = vpack.c.bf16 %v1750_v24, %v1749_v23  ;;  %v61_v44 = vld [vmem:[#allocation5] sm:$0xff] }
 0xb2a   :  { %4123 = vmatprep.subr.bf16.mxu0 %v4122_v51  ;;  %v1592_v4 = vsel %vm1591_vm5, %v1589_v3, %v1576_v63 }
 0xb2b   :  { %v1408_v55 = vsub.f32 2.0, %v1406_v54  ;;  %4127 = vmatprep.subr.bf16.mxu1 %v4126_v40 }
 0xb2d   :  { %v1410_v56 = vmul.f32 %v4264_v53, %v1408_v55  ;;  %4125 = vmatpush3.bf16.msra.mxu0 %v4122_v51 }
 0xb2f   :  { %v1412_v57 = vmul.f32 %v4260_v19, %v1410_v56  ;;  %v1751_v19 = vld [vmem:[#allocation7 + $0x38] sm:$0xff] }
 0xb30   :  { %v4746_v32 = vpack.i.bf16 %v1752_v25, %v1751_v19  ;;  %v4130_v45 = vpack.c.bf16 %v1752_v25, %v1751_v19  ;;  %v62_v56 = vld [vmem:[#allocation5 + $0x8] sm:$0xff] }
 0xb31   :  { %3962 = vmatmul.mubr.msk.f32.vlgmr.msra.gmra.mrb[18].mxu1 %vm207_vm2, %v1412_v57 }
 0xb32   :  { %4129 = vmatpush3.bf16.msra.mxu1 %v4126_v40 }
 0xb33   :  { %4131 = vmatprep.subr.bf16.mxu1 %v4130_v45 }
 0xb36   :  { %4133 = vmatpush3.bf16.msra.mxu1 %v4130_v45 }
 0xb37   :  { %3997 = vmatprep.subr.mxu1 %v4408_v37 }
 0xbfb   :  { %v1485_v58 = vpop.f32.mrb[12].mxu0 }
 0xbfc   :  { %1583 = vrot.lane.b32.xlu0 %v1485_v58, %s4405_s18  ;;  %v3958_v59 = vpop.f32.mrb[13].mxu0 }
 0xc00   :  { %1623 = vrot.lane.b32.xlu0 %v4537_v38, %s4407_s5  ;;  %v1578_v38 = vpop.permute.xlu1 %1577 }
 0xc01   :  { %v1593_v8 = vsel %vm1591_vm5, %v1590_v7, %v1578_v38 }
 0xc04   :  { %v1561_v60 = vpop.f32.mrb[18].mxu1 }
 0xc05   :  { %1585 = vrot.lane.b32.xlu1 %v1561_v60, %s4405_s18  ;;  %v3963_v61 = vpop.f32.mrb[19].mxu1 }
 0xc6e   :  { %v1584_v5 = vpop.permute.xlu0 %1583 }
 0xc6f   :  { %v1595_v6 = vsel %vm1594_vm4, %v1592_v4, %v1584_v5 }
 0xc70   :  { %3972 = vmatprep.mubr.msk.f32.mxu0 %vm69_vm0, %v1595_v6 }
 0xc72   :  { %v1624_v11 = vpop.permute.xlu0 %1623 }
 0xc77   :  { %v1586_v9 = vpop.permute.xlu1 %1585 }
 0xc78   :  { %v1596_v10 = vsel %vm1594_vm4, %v1593_v8, %v1586_v9 }
 0xc79   :  { %3973 = vmatmul.mubr.msk.f32.vlgmr.msra.gmra.mrb[14].mxu0 %vm69_vm0, %v1596_v10 }
 0xc7a   :  { %3994 = vmatprep.mubr.msk.f32.mxu0 %vm69_vm0, %v61_v44 }
 0xd4c   :  { %v3974_v34 = vpop.f32.mrb[14].mxu0 }
 0xd4d   :  { %v1704_v12 = vadd.f32 %v3974_v34, %v1624_v11  ;;  %v1698_v13 = vpop.f32.mrb[15].mxu0 }
 0xd4e   :  { %v1699_v17 = vadd.f32 %v1698_v13, %v1624_v11 }
 0xd4f   :  { %v4722_v20 = vadd.f32 %v1704_v12, %v4499_v1 }
 0xd50   :  { %v4725_v21 = vadd.f32 %v1699_v17, %v4497_v0  ;;  %v4738_v0 = vld [vmem:[%s5003_s3 + $0x3] ss:$0 sm:$0xff] }
 0xd51   :  { %v1713_v36 = vsel %vm69_vm0, %v4722_v20, 0.0 }
 0xd52   :  { %1714 = vadd.xlane.f32.xlu0 %v1713_v36  ;;  %v1710_v22 = vsel %vm69_vm0, %v4725_v21, 0.0 }
 0xd53   :  { %1711 = vadd.xlane.f32.xlu1 %v1710_v22 }
 0xd64   :  { %4200 = vrot.lane.b32.xlu1 %v4731_v26, %s4410_s8 }
 0xd68   :  { %1744 = vrot.lane.b32.xlu1 %v4738_v0, %s4410_s8 }
 0xd6c   :  { %1857 = vrot.lane.b32.xlu1 %v4755_v46, %s4410_s8 }
 0xddf   :  { %v1715_v1 = vpop.xlane.xlu0 %1714 }
 0xde0   :  { %v1717_v27 = vmul.f32 0.03125, %v1715_v1  ;;  %v1712_v28 = vpop.xlane.xlu1 %1711 }
 0xde1   :  { %v1716_v29 = vmul.f32 0.03125, %v1712_v28 }
 0xde2   :  { %v1719_v42 = vsub.f32 %v4722_v20, %v1717_v27 }
 0xde3   :  { %v1718_v30 = vsub.f32 %v4725_v21, %v1716_v29 }
 0xde4   :  { %v1721_v15 = vmul.f32 %v1719_v42, %v1719_v42  ;;  %v4201_v33 = vpop.permute.xlu1 %4200 }
 0xde5   :  { %v1720_v31 = vmul.f32 %v1718_v30, %v1718_v30  ;;  %v4203_v35 = vunpack.i.h.bf16 %v4201_v33  ;;  %v4202_v39 = vunpack.i.l.bf16 %v4201_v33 }
 0xde6   :  { %v1725_v16 = vsel %vm69_vm0, %v1721_v15, 0.0 }
 0xde7   :  { %1726 = vadd.xlane.f32.xlu0 %v1725_v16  ;;  %v1722_v18 = vsel %vm69_vm0, %v1720_v31, 0.0  ;;  %v4134_v43 = vpack.c.bf16 %v4203_v35, %v4202_v39 }
 0xde8   :  { %v1745_v63 = vpop.permute.xlu1 %1744 }
 0xde9   :  { %4135 = vmatprep.subr.bf16.mxu0 %v4134_v43 }
 0xdea   :  { %4137 = vmatpush3.bf16.msra.mxu0 %v4134_v43 }
 0xdeb   :  { %1723 = vadd.xlane.f32.xlu0 %v1722_v18 }
 0xdec   :  { %v1858_v4 = vpop.permute.xlu1 %1857 }
 0xe01   :  { %4205 = vrot.lane.b32.xlu0 %v4746_v32, %s4410_s8 }
 0xe74   :  { %v1727_v47 = vpop.xlane.xlu0 %1726 }
 0xe75   :  { %v1729_v48 = vmul.f32 0.03125, %v1727_v47 }
 0xe77   :  { %v1731_v50 = vadd.f32 1e-05, %v1729_v48 }
 0xe78   :  { %v1724_v41 = vpop.xlane.xlu0 %1723 }
 0xe79   :  { %4265 = vrsqrt.f32 %v1731_v50  ;;  %v1728_v14 = vmul.f32 0.03125, %v1724_v41 }
 0xe7b   :  { %v1730_v51 = vadd.f32 1e-05, %v1728_v14 }
 0xe7c   :  { %v4206_v52 = vpop.permute.xlu0 %4205 }
 0xe7d   :  { %4267 = vrsqrt.f32 %v1730_v51  ;;  %v4208_v53 = vunpack.i.h.bf16 %v4206_v52  ;;  %v4207_v54 = vunpack.i.l.bf16 %v4206_v52 }
 0xe7f   :  { %v4138_v55 = vpack.c.bf16 %v4208_v53, %v4207_v54 }
 0xe81   :  { %4139 = vmatprep.subr.bf16.mxu0 %v4138_v55 }
 0xe82   :  { %4141 = vmatpush3.bf16.msra.mxu0 %v4138_v55 }
 0xe83   :  { %v4266_v57 = vpop.eup %4265  ;;  %4007 = vmatprep.subr.mxu0 %v4408_v37 }
 0xe84   :  { %v1735_v58 = vmul.f32 %v4266_v57, %v1719_v42 }
 0xe85   :  { %3995 = vmatmul.mubr.msk.f32.vlgmr.msra.gmra.mrb[16].mxu0 %vm69_vm0, %v62_v56 }
 0xe86   :  { %4009 = vmatprep.mubr.msk.f32.mxu0 %vm4409_vm1, %v4408_v37  ;;  %v1743_v61 = vmul.f32 %v4738_v0, %v1735_v58 }
 0xe87   :  { %v4268_v59 = vpop.eup %4267 }
 0xe88   :  { %v1734_v60 = vmul.f32 %v4268_v59, %v1718_v30  ;;  %v1748_v3 = vadd.f32 %v1745_v63, %v1743_v61 }
 0xe8a   :  { %v1742_v62 = vmul.f32 %v4738_v0, %v1734_v60 }
 0xe8c   :  { %v1747_v2 = vadd.f32 %v1745_v63, %v1742_v62 }
 0xe8e   :  { %3983 = vmatprep.mubr.msk.f32.mxu1 %vm69_vm0, %v1747_v2 }
 0xe8f   :  { %3984 = vmatmul.mubr.msk.f32.vlgmr.msra.gmra.mrb[20].mxu1 %vm69_vm0, %v1748_v3 }
 0xe90   :  { %3999 = vmatprep.mubr.msk.f32.mxu1 %vm4409_vm1, %v4408_v37 }
 0xf58   :  { %v3996_v5 = vpop.f32.mrb[16].mxu0 }
 0xf59   :  { %v1932_v6 = vpop.f32.mrb[17].mxu0  ;;  %v4777_v10 = vadd.f32 %v3996_v5, %v1858_v4 }
 0xf5a   :  { %v4769_v38 = vadd.f32 %v1932_v6, %v1858_v4 }
 0xf5c   :  { %3998 = vmatpush3.xpose.msk.msra.mxu1 %vm207_vm2, %v4769_v38 }
 0xf5d   :  { %4002 = vmatprep.subr.mxu1 %v4408_v37 }
 0xf62   :  { %v3985_v7 = vpop.f32.mrb[20].mxu1 }
 0xf63   :  { %v1832_v8 = vpop.f32.mrb[21].mxu1  ;;  %v4786_v11 = vadd.f32 %v3985_v7, %v4755_v46 }
 0xf64   :  { %v4775_v9 = vadd.f32 %v4755_v46, %v1832_v8 }
 0xf66   :  { %4000 = vmatmul.mubr.msk.f32.vlgmr.msra.gmra.mrb[22].mxu1 %vm207_vm2, %v4775_v9 }
 0xf67   :  { %4003 = vmatpush3.xpose.msk.msra.mxu1 %vm207_vm2, %v4777_v10  ;;  %4004 = vmatprep.mubr.msk.f32.mxu1 %vm4409_vm1, %v4408_v37 }
 0xf68   :  { %4012 = vmatprep.subr.mxu1 %v4408_v37 }
 0xf6a   :  { %4005 = vmatmul.mubr.msk.f32.vlgmr.msra.gmra.mrb[24].mxu1 %vm207_vm2, %v4786_v11 }
 0xf6b   :  { %4014 = vmatprep.mubr.msk.f32.mxu1 %vm4409_vm1, %v4408_v37 }
0x1039   :  { %v2013_v34 = vpop.f32.mrb[22].mxu1 }
0x103a   :  { %v2093_v12 = vmul.f32 0.17677669, %v2013_v34  ;;  %v4001_v13 = vpop.f32.mrb[23].mxu1 }
0x103c   :  { %v2095_v17 = vsel %vm4561_vm3, %v2093_v12, -1e+30 }
0x103d   :  { %v2089_v36 = vpop.f32.mrb[24].mxu1  ;;  %v2097_v22 = vsel %vm207_vm2, %v2095_v17, -inf }
0x103e   :  { %v2094_v23 = vmul.f32 0.17677669, %v2089_v36  ;;  %2098 = vmax.xlane.f32.xlu1 %v2097_v22  ;;  %v4006_v24 = vpop.f32.mrb[25].mxu1 }
0x1040   :  { %v2096_v1 = vsel %vm4561_vm3, %v2094_v23, -1e+30 }
0x1041   :  { %v2100_v27 = vsel %vm207_vm2, %v2096_v1, -inf }
0x1042   :  { %2101 = vmax.xlane.f32.xlu0 %v2100_v27 }
0x104f   :  { %2125 = vrot.lane.b32.xlu1 %v4769_v38, %s4410_s8 }
0x1053   :  { %2279 = vrot.lane.b32.xlu1 %v4769_v38, %s4412_s10 }
0x1057   :  { %2357 = vrot.lane.b32.xlu1 %v4777_v10, %s4412_s10 }
0x105b   :  { %2277 = vrot.lane.b32.xlu1 %v4775_v9, %s4412_s10 }
0x10cb   :  { %v2099_v28 = vpop.xlane.xlu1 %2098 }
0x10cc   :  { %v2103_v29 = vsub.f32 %v2095_v17, %v2099_v28 }
0x10ce   :  { %v2105_v42 = vmul.f32 1.442695, %v2103_v29 }
0x10cf   :  { %v2126_v30 = vpop.permute.xlu1 %2125  ;;  %v2102_v15 = vpop.xlane.xlu0 %2101 }
0x10d0   :  { %4269 = vpow2.f32 %v2105_v42  ;;  %v2104_v16 = vsub.f32 %v2096_v1, %v2102_v15  ;;  %4008 = vmatpush3.msra.mxu0 %v2126_v30 }
0x10d1   :  { %4017 = vmatprep.subr.mxu0 %v4408_v37 }
0x10d2   :  { %v2107_v31 = vmul.f32 1.442695, %v2104_v16 }
0x10d3   :  { %v2280_v44 = vpop.permute.xlu1 %2279 }
0x10d4   :  { %4271 = vpow2.f32 %v2107_v31 }
0x10d7   :  { %v2358_v14 = vpop.permute.xlu1 %2357 }
0x10da   :  { %v4270_v18 = vpop.eup %4269 }
0x10db   :  { %v2109_v19 = vsel %vm207_vm2, %v4270_v18, 0.0  ;;  %v2278_v55 = vpop.permute.xlu1 %2277 }
0x10dc   :  { %2110 = vadd.xlane.f32.xlu0 %v2109_v19 }
0x10de   :  { %v4272_v25 = vpop.eup %4271 }
0x10df   :  { %v2112_v33 = vsel %vm207_vm2, %v4272_v25, 0.0 }
0x10e0   :  { %2113 = vadd.xlane.f32.xlu0 %v2112_v33 }
0x10f6   :  { %2201 = vrot.lane.b32.xlu0 %v4777_v10, %s4410_s8 }
0x10fa   :  { %2355 = vrot.lane.b32.xlu0 %v4786_v11, %s4412_s10 }
0x1169   :  { %v2111_v35 = vpop.xlane.xlu0 %2110 }
0x116a   :  { %4273 = vrcp.f32 %v2111_v35 }
0x116d   :  { %v2114_v39 = vpop.xlane.xlu0 %2113 }
0x116e   :  { %4275 = vrcp.f32 %v2114_v39 }
0x1171   :  { %v2202_v40 = vpop.permute.xlu0 %2201 }
0x1172   :  { %4013 = vmatpush3.msra.mxu1 %v2202_v40 }
0x1173   :  { %4022 = vmatprep.subr.mxu1 %v4408_v37 }
0x1174   :  { %v4274_v43 = vpop.eup %4273 }
0x1175   :  { %v2117_v45 = vmul.f32 %v4274_v43, %v2111_v35  ;;  %v2356_v56 = vpop.permute.xlu0 %2355 }
0x1177   :  { %v2119_v47 = vsub.f32 2.0, %v2117_v45 }
0x1178   :  { %v4276_v48 = vpop.eup %4275 }
0x1179   :  { %v2121_v50 = vmul.f32 %v4274_v43, %v2119_v47  ;;  %v2118_v41 = vmul.f32 %v4276_v48, %v2114_v39 }
0x117b   :  { %v2123_v51 = vmul.f32 %v4270_v18, %v2121_v50  ;;  %v2120_v52 = vsub.f32 2.0, %v2118_v41 }
0x117d   :  { %v2122_v53 = vmul.f32 %v4276_v48, %v2120_v52  ;;  %4010 = vmatmul.mubr.msk.f32.vlgmr.msra.gmra.mrb[18].mxu0 %vm207_vm2, %v2123_v51 }
0x117e   :  { %4018 = vmatpush3.xpose.msk.msra.mxu0 %vm207_vm2, %v2280_v44  ;;  %4019 = vmatprep.mubr.msk.f32.mxu0 %vm4409_vm1, %v4408_v37 }
0x117f   :  { %v2124_v54 = vmul.f32 %v4272_v25, %v2122_v53  ;;  %4027 = vmatprep.subr.mxu0 %v4408_v37 }
0x1181   :  { %4015 = vmatmul.mubr.msk.f32.vlgmr.msra.gmra.mrb[26].mxu1 %vm207_vm2, %v2124_v54  ;;  %4020 = vmatmul.mubr.msk.f32.vlgmr.msra.gmra.mrb[20].mxu0 %vm207_vm2, %v2278_v55 }
0x1182   :  { %4023 = vmatpush3.xpose.msk.msra.mxu1 %vm207_vm2, %v2358_v14  ;;  %4024 = vmatprep.mubr.msk.f32.mxu1 %vm4409_vm1, %v4408_v37 }
0x1183   :  { %4032 = vmatprep.subr.mxu1 %v4408_v37  ;;  %4029 = vmatprep.mubr.msk.f32.mxu0 %vm4409_vm1, %v4408_v37 }
0x1185   :  { %4025 = vmatmul.mubr.msk.f32.vlgmr.msra.gmra.mrb[28].mxu1 %vm207_vm2, %v2356_v56 }
0x1186   :  { %4034 = vmatprep.mubr.msk.f32.mxu1 %vm4409_vm1, %v4408_v37 }
0x1250   :  { %v4831_v57 = vpop.f32.mrb[18].mxu0 }
0x1251   :  { %v4011_v58 = vpop.f32.mrb[19].mxu0 }
0x1254   :  { %v4833_v59 = vpop.f32.mrb[26].mxu1  ;;  %v2351_v60 = vpop.f32.mrb[20].mxu0 }
0x1255   :  { %v2433_v61 = vmul.f32 0.17677669, %v2351_v60  ;;  %v4016_v62 = vpop.f32.mrb[27].mxu1  ;;  %v4021_v63 = vpop.f32.mrb[21].mxu0 }
0x1257   :  { %v2435_v2 = vsel %vm4561_vm3, %v2433_v61, -1e+30 }
0x1258   :  { %v2429_v3 = vpop.f32.mrb[28].mxu1  ;;  %v2437_v4 = vsel %vm207_vm2, %v2435_v2, -inf }
0x1259   :  { %v2434_v5 = vmul.f32 0.17677669, %v2429_v3  ;;  %2438 = vmax.xlane.f32.xlu1 %v2437_v4  ;;  %v4026_v6 = vpop.f32.mrb[29].mxu1 }
0x125b   :  { %v2436_v7 = vsel %vm4561_vm3, %v2434_v5, -1e+30 }
0x125c   :  { %v2440_v8 = vsel %vm207_vm2, %v2436_v7, -inf }
0x125d   :  { %2441 = vmax.xlane.f32.xlu0 %v2440_v8 }
0x126a   :  { %2465 = vrot.lane.b32.xlu1 %v4769_v38, %s4411_s9 }
0x126e   :  { %2619 = vrot.lane.b32.xlu1 %v4769_v38, %s4415_s1 }
0x1272   :  { %2697 = vrot.lane.b32.xlu1 %v4777_v10, %s4415_s1 }
0x1276   :  { %2617 = vrot.lane.b32.xlu1 %v4775_v9, %s4415_s1 }
0x12e6   :  { %v2439_v34 = vpop.xlane.xlu1 %2438 }
0x12e7   :  { %v2443_v12 = vsub.f32 %v2435_v2, %v2439_v34 }
0x12e9   :  { %v2445_v13 = vmul.f32 1.442695, %v2443_v12 }
0x12ea   :  { %v2466_v17 = vpop.permute.xlu1 %2465  ;;  %v2442_v36 = vpop.xlane.xlu0 %2441 }
0x12eb   :  { %4277 = vpow2.f32 %v2445_v13  ;;  %v2444_v22 = vsub.f32 %v2436_v7, %v2442_v36  ;;  %4028 = vmatpush3.msra.mxu0 %v2466_v17 }
0x12ec   :  { %4037 = vmatprep.subr.mxu0 %v4408_v37 }
0x12ed   :  { %v2447_v23 = vmul.f32 1.442695, %v2444_v22 }
0x12ee   :  { %v2620_v16 = vpop.permute.xlu1 %2619 }
0x12ef   :  { %4279 = vpow2.f32 %v2447_v23 }
0x12f2   :  { %v2698_v35 = vpop.permute.xlu1 %2697 }
0x12f5   :  { %v4278_v24 = vpop.eup %4277 }
0x12f6   :  { %v2449_v1 = vsel %vm207_vm2, %v4278_v24, 0.0  ;;  %v2618_v45 = vpop.permute.xlu1 %2617 }
0x12f7   :  { %2450 = vadd.xlane.f32.xlu0 %v2449_v1 }
0x12f9   :  { %v4280_v27 = vpop.eup %4279 }
0x12fa   :  { %v2452_v28 = vsel %vm207_vm2, %v4280_v27, 0.0 }
0x12fb   :  { %2453 = vadd.xlane.f32.xlu0 %v2452_v28 }
0x1311   :  { %2541 = vrot.lane.b32.xlu0 %v4777_v10, %s4411_s9 }
0x1315   :  { %2695 = vrot.lane.b32.xlu0 %v4786_v11, %s4415_s1 }
0x1384   :  { %v2451_v29 = vpop.xlane.xlu0 %2450 }
0x1385   :  { %4281 = vrcp.f32 %v2451_v29 }
0x1388   :  { %v2454_v42 = vpop.xlane.xlu0 %2453 }
0x1389   :  { %4283 = vrcp.f32 %v2454_v42 }
0x138c   :  { %v2542_v30 = vpop.permute.xlu0 %2541 }
0x138d   :  { %4033 = vmatpush3.msra.mxu1 %v2542_v30 }
0x138e   :  { %4042 = vmatprep.subr.mxu1 %v4408_v37 }
0x138f   :  { %v4282_v15 = vpop.eup %4281 }
0x1390   :  { %v2457_v31 = vmul.f32 %v4282_v15, %v2451_v29  ;;  %v2696_v47 = vpop.permute.xlu0 %2695 }
0x1392   :  { %v2459_v18 = vsub.f32 2.0, %v2457_v31 }
0x1393   :  { %v4284_v19 = vpop.eup %4283 }
0x1394   :  { %v2461_v25 = vmul.f32 %v4282_v15, %v2459_v18  ;;  %v2458_v33 = vmul.f32 %v4284_v19, %v2454_v42 }
0x1396   :  { %v2463_v39 = vmul.f32 %v4278_v24, %v2461_v25  ;;  %v2460_v40 = vsub.f32 2.0, %v2458_v33 }
0x1398   :  { %v2462_v43 = vmul.f32 %v4284_v19, %v2460_v40  ;;  %4030 = vmatmul.mubr.msk.f32.vlgmr.msra.gmra.mrb[22].mxu0 %vm207_vm2, %v2463_v39 }
0x1399   :  { %4038 = vmatpush3.xpose.msk.msra.mxu0 %vm207_vm2, %v2620_v16  ;;  %4039 = vmatprep.mubr.msk.f32.mxu0 %vm4409_vm1, %v4408_v37 }
0x139a   :  { %v2464_v44 = vmul.f32 %v4280_v27, %v2462_v43  ;;  %4047 = vmatprep.subr.mxu0 %v4408_v37 }
0x139c   :  { %4035 = vmatmul.mubr.msk.f32.vlgmr.msra.gmra.mrb[30].mxu1 %vm207_vm2, %v2464_v44  ;;  %4040 = vmatmul.mubr.msk.f32.vlgmr.msra.gmra.mrb[24].mxu0 %vm207_vm2, %v2618_v45 }
0x139d   :  { %4043 = vmatpush3.xpose.msk.msra.mxu1 %vm207_vm2, %v2698_v35  ;;  %4044 = vmatprep.mubr.msk.f32.mxu1 %vm4409_vm1, %v4408_v37 }
0x139e   :  { %4052 = vmatprep.subr.mxu1 %v4408_v37  ;;  %4049 = vmatprep.mubr.msk.f32.mxu0 %vm4409_vm1, %v4408_v37 }
0x13a0   :  { %4045 = vmatmul.mubr.msk.f32.vlgmr.msra.gmra.mrb[32].mxu1 %vm207_vm2, %v2696_v47 }
0x13a1   :  { %4054 = vmatprep.mubr.msk.f32.mxu1 %vm4409_vm1, %v4408_v37 }
0x146b   :  { %v4873_v48 = vpop.f32.mrb[22].mxu0 }
0x146c   :  { %v4031_v50 = vpop.f32.mrb[23].mxu0 }
0x146f   :  { %v4875_v41 = vpop.f32.mrb[30].mxu1  ;;  %v2691_v14 = vpop.f32.mrb[24].mxu0 }
0x1470   :  { %v2773_v51 = vmul.f32 0.17677669, %v2691_v14  ;;  %v4036_v52 = vpop.f32.mrb[31].mxu1  ;;  %v4041_v53 = vpop.f32.mrb[25].mxu0 }
0x1472   :  { %v2775_v54 = vsel %vm4561_vm3, %v2773_v51, -1e+30 }
0x1473   :  { %v2769_v55 = vpop.f32.mrb[32].mxu1  ;;  %v2777_v56 = vsel %vm207_vm2, %v2775_v54, -inf }
0x1474   :  { %v2774_v58 = vmul.f32 0.17677669, %v2769_v55  ;;  %2778 = vmax.xlane.f32.xlu1 %v2777_v56  ;;  %v4046_v60 = vpop.f32.mrb[33].mxu1 }
0x1476   :  { %v2776_v61 = vsel %vm4561_vm3, %v2774_v58, -1e+30 }
0x1477   :  { %v2780_v62 = vsel %vm207_vm2, %v2776_v61, -inf }
0x1478   :  { %2781 = vmax.xlane.f32.xlu0 %v2780_v62 }
0x1485   :  { %2805 = vrot.lane.b32.xlu1 %v4769_v38, %s4414_s12 }
0x1489   :  { %2959 = vrot.lane.b32.xlu1 %v4769_v38, %s4418_s15 }
0x148d   :  { %3037 = vrot.lane.b32.xlu1 %v4777_v10, %s4418_s15 }
0x1491   :  { %2957 = vrot.lane.b32.xlu1 %v4775_v9, %s4418_s15 }
0x1501   :  { %v2779_v63 = vpop.xlane.xlu1 %2778 }
0x1502   :  { %v2783_v2 = vsub.f32 %v2775_v54, %v2779_v63 }
0x1504   :  { %v2785_v3 = vmul.f32 1.442695, %v2783_v2 }
0x1505   :  { %v2806_v4 = vpop.permute.xlu1 %2805  ;;  %v2782_v5 = vpop.xlane.xlu0 %2781 }
0x1506   :  { %4285 = vpow2.f32 %v2785_v3  ;;  %v2784_v6 = vsub.f32 %v2776_v61, %v2782_v5  ;;  %4048 = vmatpush3.msra.mxu0 %v2806_v4 }
0x1507   :  { %4057 = vmatprep.subr.mxu0 %v4408_v37 }
0x1508   :  { %v2787_v7 = vmul.f32 1.442695, %v2784_v6 }
0x1509   :  { %v2960_v23 = vpop.permute.xlu1 %2959 }
0x150a   :  { %4287 = vpow2.f32 %v2787_v7 }
0x150d   :  { %v3038_v42 = vpop.permute.xlu1 %3037 }
0x1510   :  { %v4286_v8 = vpop.eup %4285 }
0x1511   :  { %v2789_v34 = vsel %vm207_vm2, %v4286_v8, 0.0  ;;  %v2958_v31 = vpop.permute.xlu1 %2957 }
0x1512   :  { %2790 = vadd.xlane.f32.xlu0 %v2789_v34 }
0x1514   :  { %v4288_v12 = vpop.eup %4287 }
0x1515   :  { %v2792_v13 = vsel %vm207_vm2, %v4288_v12, 0.0 }
0x1516   :  { %2793 = vadd.xlane.f32.xlu0 %v2792_v13 }
0x152c   :  { %2881 = vrot.lane.b32.xlu0 %v4777_v10, %s4414_s12 }
0x1530   :  { %3035 = vrot.lane.b32.xlu0 %v4786_v11, %s4418_s15 }
0x159f   :  { %v2791_v9 = vpop.xlane.xlu0 %2790 }
0x15a0   :  { %4289 = vrcp.f32 %v2791_v9 }
0x15a3   :  { %v2794_v17 = vpop.xlane.xlu0 %2793 }
0x15a4   :  { %4291 = vrcp.f32 %v2794_v17 }
0x15a7   :  { %v2882_v36 = vpop.permute.xlu0 %2881 }
0x15a8   :  { %4053 = vmatpush3.msra.mxu1 %v2882_v36 }
0x15a9   :  { %4062 = vmatprep.subr.mxu1 %v4408_v37 }
0x15aa   :  { %v4290_v22 = vpop.eup %4289 }
0x15ab   :  { %v2797_v24 = vmul.f32 %v4290_v22, %v2791_v9  ;;  %v3036_v18 = vpop.permute.xlu0 %3035 }
0x15ad   :  { %v2799_v1 = vsub.f32 2.0, %v2797_v24 }
0x15ae   :  { %v4292_v27 = vpop.eup %4291 }
0x15af   :  { %v2801_v28 = vmul.f32 %v4290_v22, %v2799_v1  ;;  %v2798_v29 = vmul.f32 %v4292_v27, %v2794_v17 }
0x15b1   :  { %v2803_v30 = vmul.f32 %v4286_v8, %v2801_v28  ;;  %v2800_v15 = vsub.f32 2.0, %v2798_v29 }
0x15b3   :  { %v2802_v16 = vmul.f32 %v4292_v27, %v2800_v15  ;;  %4050 = vmatmul.mubr.msk.f32.vlgmr.msra.gmra.mrb[26].mxu0 %vm207_vm2, %v2803_v30 }
0x15b4   :  { %4058 = vmatpush3.xpose.msk.msra.mxu0 %vm207_vm2, %v2960_v23  ;;  %4059 = vmatprep.mubr.msk.f32.mxu0 %vm4409_vm1, %v4408_v37 }
0x15b5   :  { %v2804_v11 = vmul.f32 %v4288_v12, %v2802_v16  ;;  %4067 = vmatprep.subr.mxu0 %v4408_v37 }
0x15b7   :  { %4055 = vmatmul.mubr.msk.f32.vlgmr.msra.gmra.mrb[34].mxu1 %vm207_vm2, %v2804_v11  ;;  %4060 = vmatmul.mubr.msk.f32.vlgmr.msra.gmra.mrb[28].mxu0 %vm207_vm2, %v2958_v31 }
0x15b8   :  { %4063 = vmatpush3.xpose.msk.msra.mxu1 %vm207_vm2, %v3038_v42  ;;  %4064 = vmatprep.mubr.msk.f32.mxu1 %vm4409_vm1, %v4408_v37 }
0x15b9   :  { %4072 = vmatprep.subr.mxu1 %v4408_v37  ;;  %4069 = vmatprep.mubr.msk.f32.mxu0 %vm4409_vm1, %v4408_v37 }
0x15bb   :  { %4065 = vmatmul.mubr.msk.f32.vlgmr.msra.gmra.mrb[36].mxu1 %vm207_vm2, %v3036_v18 }
0x15bc   :  { %4074 = vmatprep.mubr.msk.f32.mxu1 %vm4409_vm1, %v4408_v37 }
0x1686   :  { %v2877_v19 = vpop.f32.mrb[26].mxu0 }
0x1687   :  { %v4051_v25 = vpop.f32.mrb[27].mxu0 }
0x168a   :  { %v2953_v33 = vpop.f32.mrb[34].mxu1  ;;  %v3031_v35 = vpop.f32.mrb[28].mxu0 }
0x168b   :  { %v3113_v39 = vmul.f32 0.17677669, %v3031_v35  ;;  %v4056_v40 = vpop.f32.mrb[35].mxu1  ;;  %v4061_v43 = vpop.f32.mrb[29].mxu0 }
0x168d   :  { %v3115_v44 = vsel %vm4561_vm3, %v3113_v39, -1e+30 }
0x168e   :  { %v3109_v45 = vpop.f32.mrb[36].mxu1  ;;  %v3117_v47 = vsel %vm207_vm2, %v3115_v44, -inf }
0x168f   :  { %v3114_v50 = vmul.f32 0.17677669, %v3109_v45  ;;  %3118 = vmax.xlane.f32.xlu1 %v3117_v47  ;;  %v4066_v14 = vpop.f32.mrb[37].mxu1 }
0x1691   :  { %v3116_v51 = vsel %vm4561_vm3, %v3114_v50, -1e+30 }
0x1692   :  { %v3120_v37 = vsel %vm207_vm2, %v3116_v51, -inf }
0x1693   :  { %3121 = vmax.xlane.f32.xlu0 %v3120_v37 }
0x16a0   :  { %3145 = vrot.lane.b32.xlu1 %v4769_v38, %s4417_s14 }
0x16a4   :  { %4210 = vrot.lane.b32.xlu1 %v4731_v26, %s4407_s5 }
0x16a8   :  { %4215 = vrot.lane.b32.xlu1 %v4746_v32, %s4407_s5 }
0x16ac   :  { %3299 = vrot.lane.b32.xlu1 %v4873_v48, %s4402_s28 }
0x16b0   :  { %3307 = vrot.lane.b32.xlu1 %v2877_v19, %s4420_s17 }
0x171c   :  { %v3119_v52 = vpop.xlane.xlu1 %3118 }
0x171d   :  { %v3123_v49 = vsub.f32 %v3115_v44, %v3119_v52 }
0x171f   :  { %v3125_v53 = vmul.f32 1.442695, %v3123_v49 }
0x1720   :  { %v3146_v54 = vpop.permute.xlu1 %3145  ;;  %v3122_v55 = vpop.xlane.xlu0 %3121 }
0x1721   :  { %4293 = vpow2.f32 %v3125_v53  ;;  %v3124_v56 = vsub.f32 %v3116_v51, %v3122_v55  ;;  %4068 = vmatpush3.msra.mxu0 %v3146_v54  ;;  %v3481_v55 = vld [vmem:[#allocation7 + $0x10] sm:$0xff] }
0x1723   :  { %v3127_v38 = vmul.f32 1.442695, %v3124_v56  ;;  %v3482_v56 = vld [vmem:[#allocation7 + $0x28] sm:$0xff] }
0x1724   :  { %v4211_v58 = vpop.permute.xlu1 %4210 }
0x1725   :  { %4295 = vpow2.f32 %v3127_v38  ;;  %v4213_v26 = vunpack.i.h.bf16 %v4211_v58  ;;  %v4212_v60 = vunpack.i.l.bf16 %v4211_v58  ;;  %v4150_v38 = vpack.c.bf16 %v3482_v56, %v3481_v55  ;;  %v3483_v58 = vld [vmem:[#allocation7 + $0x40] sm:$0xff] }
0x1727   :  { %v4142_v61 = vpack.c.bf16 %v4213_v26, %v4212_v60  ;;  %v3484_v26 = vld [vmem:[#allocation7 + $0x58] sm:$0xff]  ;;  %v4219_v60 = vpack.i.bf16 %v3482_v56, %v3481_v55 }
0x1728   :  { %v4216_v7 = vpop.permute.xlu1 %4215 }
0x1729   :  { %4143 = vmatprep.subr.bf16.mxu0 %v4142_v61  ;;  %v4218_v8 = vunpack.i.h.bf16 %v4216_v7  ;;  %v4217_v34 = vunpack.i.l.bf16 %v4216_v7 }
0x172b   :  { %v4294_v32 = vpop.eup %4293  ;;  %v4146_v17 = vpack.c.bf16 %v4218_v8, %v4217_v34 }
0x172c   :  { %v3129_v48 = vsel %vm207_vm2, %v4294_v32, 0.0  ;;  %v3300_v29 = vpop.permute.xlu1 %3299 }
0x172d   :  { %3130 = vadd.xlane.f32.xlu0 %v3129_v48  ;;  %v3321_v15 = vsel %vm207_vm2, %v4831_v57, %v3300_v29 }
0x172f   :  { %v4296_v62 = vpop.eup %4295 }
0x1730   :  { %v3132_v63 = vsel %vm207_vm2, %v4296_v62, 0.0  ;;  %v3308_v30 = vpop.permute.xlu1 %3307 }
0x1731   :  { %3133 = vadd.xlane.f32.xlu0 %v3132_v63  ;;  %v3323_v16 = vsel %vm1591_vm5, %v3321_v15, %v3308_v30 }
0x1747   :  { %3221 = vrot.lane.b32.xlu0 %v4777_v10, %s4417_s14 }
0x174b   :  { %3301 = vrot.lane.b32.xlu0 %v4875_v41, %s4402_s28 }
0x174f   :  { %3309 = vrot.lane.b32.xlu0 %v2953_v33, %s4420_s17 }
0x17ba   :  { %v3131_v2 = vpop.xlane.xlu0 %3130 }
0x17bb   :  { %4297 = vrcp.f32 %v3131_v2 }
0x17be   :  { %v3134_v3 = vpop.xlane.xlu0 %3133 }
0x17bf   :  { %4299 = vrcp.f32 %v3134_v3 }
0x17c2   :  { %v3222_v4 = vpop.permute.xlu0 %3221 }
0x17c3   :  { %4073 = vmatpush3.msra.mxu1 %v3222_v4 }
0x17c4   :  { %4151 = vmatprep.subr.bf16.mxu1 %v4150_v38 }
0x17c5   :  { %v4298_v5 = vpop.eup %4297 }
0x17c6   :  { %v3137_v6 = vmul.f32 %v4298_v5, %v3131_v2  ;;  %v3302_v42 = vpop.permute.xlu0 %3301 }
0x17c7   :  { %v3322_v19 = vsel %vm207_vm2, %v4833_v59, %v3302_v42 }
0x17c8   :  { %v3139_v12 = vsub.f32 2.0, %v3137_v6 }
0x17c9   :  { %v4300_v13 = vpop.eup %4299 }
0x17ca   :  { %v3141_v9 = vmul.f32 %v4298_v5, %v3139_v12  ;;  %v3138_v10 = vmul.f32 %v4300_v13, %v3134_v3  ;;  %v3310_v11 = vpop.permute.xlu0 %3309 }
0x17cb   :  { %v3324_v25 = vsel %vm1591_vm5, %v3322_v19, %v3310_v11 }
0x17cc   :  { %v3143_v36 = vmul.f32 %v4294_v32, %v3141_v9  ;;  %v3140_v41 = vsub.f32 2.0, %v3138_v10  ;;  %v4224_v32 = vpack.i.bf16 %v3484_v26, %v3483_v58 }
0x17ce   :  { %v3142_v22 = vmul.f32 %v4300_v13, %v3140_v41  ;;  %4070 = vmatmul.mubr.msk.f32.vlgmr.msra.gmra.mrb[30].mxu0 %vm207_vm2, %v3143_v36 }
0x17cf   :  { %4145 = vmatpush3.bf16.msra.mxu0 %v4142_v61  ;;  %v4154_v61 = vpack.c.bf16 %v3484_v26, %v3483_v58 }
0x17d0   :  { %v3144_v23 = vmul.f32 %v4296_v62, %v3142_v22  ;;  %4147 = vmatprep.subr.bf16.mxu0 %v4146_v17 }
0x17d2   :  { %4075 = vmatmul.mubr.msk.f32.vlgmr.msra.gmra.mrb[38].mxu1 %vm207_vm2, %v3144_v23 }
0x17d3   :  { %4149 = vmatpush3.bf16.msra.mxu0 %v4146_v17  ;;  %4153 = vmatpush3.bf16.msra.mxu1 %v4150_v38 }
0x17d4   :  { %4155 = vmatprep.subr.bf16.mxu1 %v4154_v61 }
0x17d7   :  { %4157 = vmatpush3.bf16.msra.mxu1 %v4154_v61 }
0x18a1   :  { %v3217_v24 = vpop.f32.mrb[30].mxu0 }
0x18a2   :  { %3315 = vrot.lane.b32.xlu1 %v3217_v24, %s4405_s18  ;;  %v4071_v1 = vpop.f32.mrb[31].mxu0 }
0x18a5   :  { %v3293_v27 = vpop.f32.mrb[38].mxu1 }
0x18a6   :  { %3317 = vrot.lane.b32.xlu0 %v3293_v27, %s4405_s18  ;;  %v4076_v28 = vpop.f32.mrb[39].mxu1  ;;  %3353 = vrot.lane.b32.xlu1 %v4755_v46, %s4407_s5  ;;  %s3684_s18 = sshll.u32 %s4421_s0, 4  ;;  %s3685_s18 = int_to_ptr.vmem [resolvable:$true] %s3684_s18 }
0x18a7   :  { %v3762_v28 = vld [vmem:[%s5003_s3 + $0x2] ss:$0 sm:$0xff]  ;;  %s4371_s3 = scalar_lea.vmem %s3685_s18, 256  ;;  %p4376_p11 = scmp.lt.s32.totalorder %s3685_s18, %s3685_s18 }
0x18a8   :  { %p4372_p10 = scmp.ne.s32.totalorder %s3685_s18, %s4371_s3  ;;  %p4377_p12 = scmp.lt.s32.totalorder %s4371_s3, %s4371_s3 }
0x18aa   :  { %p4378_p13 = por %p4377_p12, %p4376_p11 }
0x18ac   :  { %p4379_p0 = pnand %p4378_p13, %p4372_p10 }
0x1914   :  { %v3316_v31 = vpop.permute.xlu1 %3315 }
0x1915   :  { %v3325_v18 = vsel %vm1594_vm4, %v3323_v16, %v3316_v31 }
0x1916   :  { %4085 = vmatprep.mubr.msk.f32.mxu0 %vm69_vm0, %v3325_v18 }
0x1918   :  { %v3318_v46 = vpop.permute.xlu0 %3317  ;;  %v3354_v35 = vpop.permute.xlu1 %3353 }
0x1919   :  { %v3326_v33 = vsel %vm1594_vm4, %v3324_v25, %v3318_v46 }
0x191a   :  { %4086 = vmatmul.mubr.msk.f32.vlgmr.msra.gmra.mrb[32].mxu0 %vm69_vm0, %v3326_v33 }
0x19ed   :  { %v4087_v57 = vpop.f32.mrb[32].mxu0 }
0x19ee   :  { %v3434_v39 = vadd.f32 %v4087_v57, %v3354_v35  ;;  %v3428_v40 = vpop.f32.mrb[33].mxu0 }
0x19ef   :  { %v3429_v43 = vadd.f32 %v3428_v40, %v3354_v35 }
0x19f0   :  { %v4954_v44 = vadd.f32 %v3434_v39, %v4722_v20 }
0x19f1   :  { %v4957_v45 = vadd.f32 %v3429_v43, %v4725_v21 }
0x19f2   :  { %v3443_v59 = vsel %vm69_vm0, %v4954_v44, 0.0 }
0x19f3   :  { %3444 = vadd.xlane.f32.xlu1 %v3443_v59  ;;  %v3440_v47 = vsel %vm69_vm0, %v4957_v45, 0.0 }
0x19f4   :  { %3441 = vadd.xlane.f32.xlu0 %v3440_v47 }
0x1a04   :  { %3476 = vrot.lane.b32.xlu1 %v4738_v0, %s4407_s5 }
0x1a08   :  { %4220 = vrot.lane.b32.xlu1 %v4219_v60, %s4410_s8 }
0x1a0c   :  { %4225 = vrot.lane.b32.xlu1 %v4224_v32, %s4410_s8 }
0x1a80   :  { %v3445_v50 = vpop.xlane.xlu1 %3444 }
0x1a81   :  { %v3447_v14 = vmul.f32 0.03125, %v3445_v50  ;;  %v3442_v51 = vpop.xlane.xlu0 %3441 }
0x1a82   :  { %v3446_v37 = vmul.f32 0.03125, %v3442_v51 }
0x1a83   :  { %v3449_v20 = vsub.f32 %v4954_v44, %v3447_v14 }
0x1a84   :  { %v3448_v21 = vsub.f32 %v4957_v45, %v3446_v37  ;;  %v3477_v3 = vpop.permute.xlu1 %3476 }
0x1a85   :  { %v3451_v52 = vmul.f32 %v3449_v20, %v3449_v20 }
0x1a86   :  { %v3450_v53 = vmul.f32 %v3448_v21, %v3448_v21 }
0x1a87   :  { %v3455_v49 = vsel %vm69_vm0, %v3451_v52, 0.0 }
0x1a88   :  { %3456 = vadd.xlane.f32.xlu0 %v3455_v49  ;;  %v3452_v54 = vsel %vm69_vm0, %v3450_v53, 0.0  ;;  %v4221_v5 = vpop.permute.xlu1 %4220 }
0x1a89   :  { %v4223_v6 = vunpack.i.h.bf16 %v4221_v5  ;;  %v4222_v7 = vunpack.i.l.bf16 %v4221_v5 }
0x1a8b   :  { %v4158_v8 = vpack.c.bf16 %v4223_v6, %v4222_v7 }
0x1a8c   :  { %3453 = vadd.xlane.f32.xlu0 %v3452_v54  ;;  %v4226_v34 = vpop.permute.xlu1 %4225 }
0x1a8d   :  { %v4228_v13 = vunpack.i.h.bf16 %v4226_v34  ;;  %v4227_v9 = vunpack.i.l.bf16 %v4226_v34  ;;  %4159 = vmatprep.subr.bf16.mxu0 %v4158_v8 }
0x1a8e   :  { %4161 = vmatpush3.bf16.msra.mxu0 %v4158_v8 }
0x1a8f   :  { %v4162_v17 = vpack.c.bf16 %v4228_v13, %v4227_v9 }
0x1a91   :  { %4163 = vmatprep.subr.bf16.mxu0 %v4162_v17 }
0x1a92   :  { %4165 = vmatpush3.bf16.msra.mxu0 %v4162_v17 }
0x1aa2   :  { %3471 = vrot.lane.b32.xlu0 %v4738_v0, %s4406_s2 }
0x1aa6   :  { %3591 = vrot.lane.b32.xlu0 %v3762_v28, %s4410_s8 }
0x1b15   :  { %v3457_v48 = vpop.xlane.xlu0 %3456 }
0x1b16   :  { %v3459_v62 = vmul.f32 0.03125, %v3457_v48 }
0x1b18   :  { %v3461_v63 = vadd.f32 1e-05, %v3459_v62 }
0x1b19   :  { %v3454_v0 = vpop.xlane.xlu0 %3453 }
0x1b1a   :  { %4301 = vrsqrt.f32 %v3461_v63  ;;  %v3458_v2 = vmul.f32 0.03125, %v3454_v0 }
0x1b1c   :  { %v3460_v4 = vadd.f32 1e-05, %v3458_v2 }
0x1b1d   :  { %v3472_v36 = vpop.permute.xlu0 %3471 }
0x1b1e   :  { %4303 = vrsqrt.f32 %v3460_v4 }
0x1b21   :  { %v3592_v31 = vpop.permute.xlu0 %3591 }
0x1b24   :  { %v4302_v12 = vpop.eup %4301 }
0x1b25   :  { %v3465_v10 = vmul.f32 %v4302_v12, %v3449_v20 }
0x1b27   :  { %v3475_v23 = vmul.f32 %v3472_v36, %v3465_v10 }
0x1b28   :  { %v4304_v41 = vpop.eup %4303 }
0x1b29   :  { %v3464_v22 = vmul.f32 %v4304_v41, %v3448_v21  ;;  %v3480_v27 = vadd.f32 %v3477_v3, %v3475_v23 }
0x1b2b   :  { %v3474_v24 = vmul.f32 %v3472_v36, %v3464_v22 }
0x1b2d   :  { %v3479_v1 = vadd.f32 %v3477_v3, %v3474_v24 }
0x1b2f   :  { %4096 = vmatprep.mubr.msk.f32.mxu1 %vm69_vm0, %v3479_v1 }
0x1b30   :  { %4097 = vmatmul.mubr.msk.f32.vlgmr.msra.gmra.mrb[40].mxu1 %vm69_vm0, %v3480_v27 }
0x1c03   :  { %v4098_v29 = vpop.f32.mrb[40].mxu1 }
0x1c04   :  { %v3570_v42 = vadd.f32 %v4098_v29, %v3762_v28  ;;  %v3564_v30 = vpop.f32.mrb[41].mxu1 }
0x1c05   :  { %v3565_v15 = vadd.f32 %v3762_v28, %v3564_v30 }
0x1c06   :  { %v3574_v11 = vmax.f32 %v3570_v42, 0.0 }
0x1c07   :  { %v3573_v16 = vmax.f32 %v3565_v15, 0.0 }
0x1c09   :  { %4107 = vmatprep.mubr.msk.f32.mxu0 %vm69_vm0, %v3573_v16 }
0x1c0a   :  { %4108 = vmatmul.mubr.msk.f32.vlgmr.msra.gmra.mrb[34].mxu0 %vm69_vm0, %v3574_v11 }
0x1cdd   :  { %v4109_v18 = vpop.f32.mrb[34].mxu0 }
0x1cde   :  { %v3672_v19 = vadd.f32 %v4109_v18, %v3592_v31  ;;  %v3666_v25 = vpop.f32.mrb[35].mxu0 }
0x1cdf   :  { %v3667_v46 = vadd.f32 %v3666_v25, %v3592_v31 }
0x1ce0   :  { %v3676_v33 = vadd.f32 %v3672_v19, %v4954_v44 }
0x1ce1   :  { %v3675_v35 = vadd.f32 %v3667_v46, %v4957_v45 }
0x1ce2   :  { %3678 = vst.msk [vmem:[#allocation8 + $0x8] sm:$0xff] %vm69_vm0, %v3676_v33 }
0x1ce3   :  { %3677 = vst.msk [vmem:[#allocation8] sm:$0xff] %vm69_vm0, %v3675_v35 }
0x1ce4   :  { %4382 = shalt.err (!%p4379_p0)
}
0x1ce5   :  { %s4383_s29 = scalar_lea.hbm %s5004_s4, 256 }
0x1ce6   :  { %p4384_p1 = scmp.ne.s32.totalorder %s5004_s4, %s4383_s29  ;;  %p4387_p2 = scmp.lt.u32.totalorder %s4383_s29, %s5004_s4 }
0x1ce8   :  { %p4389_p3 = pnand %p4387_p2, %p4384_p1 }
0x1cea   :  { %4392 = shalt.err (!%p4389_p3)
}
0x1ceb   :  { %3690 = dma.vmem_to_hbm [thread:$0]  %s3685_s18, 256, %s5004_s4, [#allocation4], %s4401_s27, %s4401_s27, %s4402_s28  }
0x1cec   :  { %4397 = dma.done.wait [#allocation4], 256  }
0x1ced   :  { %4398 = vsyncadd [#allocation4], 4294967040 }
0x1cee   :  { %3694 = vsyncpa [#allocation3], 1 }
0x1cef   :  { %3695 = vsyncpa [#allocation6], 1 }
0x1cf0   :  { %3696 = vsyncpa [#allocation4], 1 }

</bundles_post_ra>
